<compile_context>
chip_gen: v7x
topology: tpu7x:2x2x1
jax: 0.10.0
libtpu: 0.0.40
codegen_flags: <defaults>
</compile_context>

<pallas_src>
import numpy as np
import jax
import jax.numpy as jnp
from jax import lax
from jax.experimental import pallas as pl
from jax.experimental.pallas import tpu as pltpu

_BN_EPS = 1e-5


def _down_kernel(x_ref, w1_ref, s1_ref, t1_ref, w2_ref, s2_ref, t2_ref,
                 o_ref, pad1_ref, pad2_ref):
    # x_ref : (2, 2, Hh, Wh, Cin)  pooling-window-major view of one batch element
    # w*_ref: (3, 3, Cin_k, Cout_k) conv weights (HWIO)
    # s*/t* : (1, Cout_k)          folded BatchNorm scale / shift (incl. conv bias)
    # o_ref : (Hh, Wh, Cout)
    # pad*  : (Hh+2, Wh+2, C)      padded f32 VMEM scratch (halo kept zero)
    _, _, Hh, Wh, Cin = x_ref.shape
    Cmid = w1_ref.shape[-1]
    Cout = w2_ref.shape[-1]
    Hp, Wp = Hh + 2, Wh + 2

    # ---- zero only the 1-pixel halo (interior is fully overwritten below).
    #      Re-done every step so it stays correct when the batch axis is sharded
    #      across cores (scratch is per-core); cost is O(Hh+Wh), not O(Hh*Wh). ----
    for ref in (pad1_ref, pad2_ref):
        c = ref.shape[-1]
        ref[0:1, :, :] = jnp.zeros((1, Wp, c), ref.dtype)
        ref[Hp - 1:Hp, :, :] = jnp.zeros((1, Wp, c), ref.dtype)
        ref[:, 0:1, :] = jnp.zeros((Hp, 1, c), ref.dtype)
        ref[:, Wp - 1:Wp, :] = jnp.zeros((Hp, 1, c), ref.dtype)

    # ---- MaxPool2d(kernel=2, stride=2): max over the two pooling-window axes ----
    pooled = jnp.maximum(jnp.maximum(x_ref[0, 0], x_ref[0, 1]),
                         jnp.maximum(x_ref[1, 0], x_ref[1, 1]))      # (Hh, Wh, Cin)
    pooled = pooled.astype(jnp.float32)
    pad1_ref[1:Hh + 1, 1:Wh + 1, :] = pooled
    pooled_flat = pooled.reshape(Hh * Wh, Cin)                       # reused: centre tap

    def conv3x3(pad_ref, w_ref, center_flat):
        """3x3 conv as 9 whole-plane (Hh*Wh, Cin)@(Cin, Cout) MXU matmuls.

        `center_flat` is the (ky,kx)=(1,1) window, already live in vregs, so the
        centre tap skips its VMEM load + reshape-relayout."""
        cin = pad_ref.shape[-1]
        acc = jnp.dot(center_flat, w_ref[1, 1], preferred_element_type=jnp.float32)
        for ky in range(3):
            for kx in range(3):
                if (ky, kx) == (1, 1):
                    continue
                win = pad_ref[ky:ky + Hh, kx:kx + Wh, :].reshape(Hh * Wh, cin)
                acc = acc + jnp.dot(win, w_ref[ky, kx],
                                    preferred_element_type=jnp.float32)
        return acc                                                   # (Hh*Wh, Cout) f32

    # ---- conv1 + BN + ReLU -> interior of pad2 (one block store) ----
    h1 = conv3x3(pad1_ref, w1_ref, pooled_flat)
    h1 = jnp.maximum(h1 * s1_ref[...] + t1_ref[...], 0.0)            # (Hh*Wh, Cmid) f32
    pad2_ref[1:Hh + 1, 1:Wh + 1, :] = h1.reshape(Hh, Wh, Cmid)

    # ---- conv2 + BN + ReLU -> output block (one block store) ----
    h2 = conv3x3(pad2_ref, w2_ref, h1)
    h2 = jnp.maximum(h2 * s2_ref[...] + t2_ref[...], 0.0)
    o_ref[...] = h2.reshape(Hh, Wh, Cout).astype(o_ref.dtype)


def down_forward(x_nchw, params):
    """Pallas implementation of Down.forward. Input/output are NCHW like PyTorch."""
    N, Cin, H, W = x_nchw.shape
    assert H % 2 == 0 and W % 2 == 0
    Hh, Wh = H // 2, W // 2
    Hp, Wp = Hh + 2, Wh + 2
    w1, s1, t1 = params["w1"], params["s1"], params["t1"]
    w2, s2, t2 = params["w2"], params["s2"], params["t2"]
    Cmid, Cout = w1.shape[-1], w2.shape[-1]

    # Single fused reshape+transpose from NCHW to pooling-window-major NHWC:
    # xr[n, a, b, i, j, c] = x[n, c, 2i+a, 2j+b]   (one HBM copy total)
    xr = x_nchw.reshape(N, Cin, Hh, 2, Wh, 2).transpose(0, 3, 5, 2, 4, 1)

    # Explicit scoped-VMEM budget: double-buffered in/out blocks + weights + scratch.
    itemsize = 4
    est = ((2 * (2 * 2 * Hh * Wh * Cin)            # input block (double-buffered)
            + 2 * (Hh * Wh * Cout)                 # output block (double-buffered)
            + 2 * 9 * (Cin * Cmid + Cmid * Cout)   # weights (conservatively x2)
            + Hp * Wp * (Cin + Cmid)) * itemsize)  # padded scratch
    vmem_limit = int(min(max(2 * est + (4 << 20), 16 << 20), 64 << 20))

    cost = pl.CostEstimate(
        flops=2 * 9 * N * Hh * Wh * (Cin * Cmid + Cmid * Cout),
        transcendentals=0,
        bytes_accessed=itemsize * (N * (4 * Hh * Wh * Cin + Hh * Wh * Cout)
                                   + 9 * (Cin * Cmid + Cmid * Cout)),
    )

    out_nhwc = pl.pallas_call(
        _down_kernel,
        out_shape=jax.ShapeDtypeStruct((N, Hh, Wh, Cout), x_nchw.dtype),
        grid_spec=pltpu.PrefetchScalarGridSpec(
            num_scalar_prefetch=0,
            grid=(N,),
            in_specs=[
                pl.BlockSpec((None, 2, 2, Hh, Wh, Cin),
                             lambda n: (n, 0, 0, 0, 0, 0)),
                pl.BlockSpec((3, 3, Cin, Cmid), lambda n: (0, 0, 0, 0)),
                pl.BlockSpec((1, Cmid), lambda n: (0, 0)),
                pl.BlockSpec((1, Cmid), lambda n: (0, 0)),
                pl.BlockSpec((3, 3, Cmid, Cout), lambda n: (0, 0, 0, 0)),
                pl.BlockSpec((1, Cout), lambda n: (0, 0)),
                pl.BlockSpec((1, Cout), lambda n: (0, 0)),
            ],
            out_specs=pl.BlockSpec((None, Hh, Wh, Cout), lambda n: (n, 0, 0, 0)),
            scratch_shapes=[
                pltpu.VMEM((Hp, Wp, Cin), jnp.float32),
                pltpu.VMEM((Hp, Wp, Cmid), jnp.float32),
            ],
        ),
        compiler_params=pltpu.CompilerParams(
            dimension_semantics=("parallel",),    # batch elements are independent
            vmem_limit_bytes=vmem_limit,
        ),
        cost_estimate=cost,
    )(xr, w1, s1, t1, w2, s2, t2)

    return jnp.transpose(out_nhwc, (0, 3, 1, 2))                     # back to NCHW


def init_raw_params(key, in_channels, out_channels):
    """Deterministic synthetic weights matching Down(in_channels, out_channels)."""
    mid = out_channels
    ks = jax.random.split(key, 12)

    def nrm(k, shape, scale=0.1):
        return scale * jax.random.normal(k, shape, jnp.float32)

    return {
        # conv1 (HWIO) + bias + BN1
        "w1": nrm(ks[0], (3, 3, in_channels, mid)),
        "b1": nrm(ks[1], (mid,)),
        "g1": 1.0 + nrm(ks[2], (mid,)),
        "beta1": nrm(ks[3], (mid,)),
        "m1": nrm(ks[4], (mid,)),
        "v1": 1.0 + jnp.abs(nrm(ks[5], (mid,))),
        # conv2 (HWIO) + bias + BN2
        "w2": nrm(ks[6], (3, 3, mid, out_channels)),
        "b2": nrm(ks[7], (out_channels,)),
        "g2": 1.0 + nrm(ks[8], (out_channels,)),
        "beta2": nrm(ks[9], (out_channels,)),
        "m2": nrm(ks[10], (out_channels,)),
        "v2": 1.0 + jnp.abs(nrm(ks[11], (out_channels,))),
    }


def fold_params(raw):
    """Fold conv bias + eval-mode BatchNorm into per-channel scale/shift."""
    def fold(b, g, beta, m, v):
        scale = g / jnp.sqrt(v + _BN_EPS)
        shift = (b - m) * scale + beta
        return scale.reshape(1, -1), shift.reshape(1, -1)

    s1, t1 = fold(raw["b1"], raw["g1"], raw["beta1"], raw["m1"], raw["v1"])
    s2, t2 = fold(raw["b2"], raw["g2"], raw["beta2"], raw["m2"], raw["v2"])
    return {"w1": raw["w1"], "s1": s1, "t1": t1,
            "w2": raw["w2"], "s2": s2, "t2": t2}


def down_reference(x_nchw, raw):
    """Pure-JAX reference (maxpool + conv + eval BN + relu) for validation."""
    x = jnp.transpose(x_nchw, (0, 2, 3, 1))
    x = lax.reduce_window(x, -jnp.inf, lax.max,
                          window_dimensions=(1, 2, 2, 1),
                          window_strides=(1, 2, 2, 1), padding="VALID")

    def block(x, w, b, g, beta, m, v):
        y = lax.conv_general_dilated(x, w, window_strides=(1, 1), padding="SAME",
                                     dimension_numbers=("NHWC", "HWIO", "NHWC"),
                                     precision=lax.Precision.HIGHEST)
        y = y + b
        y = g * (y - m) / jnp.sqrt(v + _BN_EPS) + beta
        return jnp.maximum(y, 0.0)

    x = block(x, raw["w1"], raw["b1"], raw["g1"], raw["beta1"], raw["m1"], raw["v1"])
    x = block(x, raw["w2"], raw["b2"], raw["g2"], raw["beta2"], raw["m2"], raw["v2"])
    return jnp.transpose(x, (0, 3, 1, 2))


if __name__ == "__main__":
    key = jax.random.PRNGKey(0)
    kx, kp = jax.random.split(key)

    N, Cin, Cout, H, W = 2, 4, 8, 16, 16
    x = jax.random.normal(kx, (N, Cin, H, W), jnp.float32)

    raw = init_raw_params(kp, Cin, Cout)
    params = fold_params(raw)

    out = down_forward(x, params)
    out = jax.block_until_ready(out)

    assert out.shape == (N, Cout, H // 2, W // 2), out.shape
    ref = down_reference(x, raw)
    np.testing.assert_allclose(np.asarray(out), np.asarray(ref), rtol=1e-4, atol=1e-4)

    print("KERNEL_OK")
</pallas_src>

<mosaic_0001>
module attributes {stable_mosaic.version = 11 : i64} {
  func.func @_down_kernel(%arg0: i32, %arg1: memref<1x2x2x8x8x4xf32, #tpu.memory_space<vmem>>, %arg2: memref<3x3x4x8xf32, #tpu.memory_space<vmem>>, %arg3: memref<1x8xf32, #tpu.memory_space<vmem>>, %arg4: memref<1x8xf32, #tpu.memory_space<vmem>>, %arg5: memref<3x3x8x8xf32, #tpu.memory_space<vmem>>, %arg6: memref<1x8xf32, #tpu.memory_space<vmem>>, %arg7: memref<1x8xf32, #tpu.memory_space<vmem>>, %arg8: memref<1x8x8x8xf32, #tpu.memory_space<vmem>>, %arg9: memref<10x10x4xf32, #tpu.memory_space<vmem>>, %arg10: memref<10x10x8xf32, #tpu.memory_space<vmem>>) attributes {dimension_semantics = [#tpu.dimension_semantics<parallel>], iteration_bounds = array<i64: 2>, scalar_prefetch = 0 : i64, scratch_operands = 2 : i64, tpu.core_type = #tpu.core_type<tc>, window_params = [{transform_indices = @transform_0, window_bounds = array<i64: 1, 2, 2, 8, 8, 4>}, {pipeline_mode = #tpu.pipeline_mode<synchronous>, transform_indices = @transform_1, window_bounds = array<i64: 3, 3, 4, 8>}, {pipeline_mode = #tpu.pipeline_mode<synchronous>, transform_indices = @transform_2, window_bounds = array<i64: 1, 8>}, {pipeline_mode = #tpu.pipeline_mode<synchronous>, transform_indices = @transform_3, window_bounds = array<i64: 1, 8>}, {pipeline_mode = #tpu.pipeline_mode<synchronous>, transform_indices = @transform_4, window_bounds = array<i64: 3, 3, 8, 8>}, {pipeline_mode = #tpu.pipeline_mode<synchronous>, transform_indices = @transform_5, window_bounds = array<i64: 1, 8>}, {pipeline_mode = #tpu.pipeline_mode<synchronous>, transform_indices = @transform_6, window_bounds = array<i64: 1, 8>}, {transform_indices = @transform_7, window_bounds = array<i64: 1, 8, 8, 8>}]} {
    %cst = arith.constant 0.000000e+00 : f32
    %0 = vector.broadcast %cst : f32 to vector<1x10x4xf32>
    %c0 = arith.constant 0 : index
    %c0_0 = arith.constant 0 : index
    %c0_1 = arith.constant 0 : index
    %1 = vector.load %arg9[%c0, %c0_0, %c0_1] : memref<10x10x4xf32, #tpu.memory_space<vmem>>, vector<1x10x4xf32>
    tpu.vector_store %arg9[%c0, %c0_0, %c0_1], %0 {strides = array<i32>} : memref<10x10x4xf32, #tpu.memory_space<vmem>>, vector<1x10x4xf32>,
    %cst_2 = arith.constant 0.000000e+00 : f32
    %2 = vector.broadcast %cst_2 : f32 to vector<1x10x4xf32>
    %c9 = arith.constant 9 : index
    %c0_3 = arith.constant 0 : index
    %c0_4 = arith.constant 0 : index
    %3 = vector.load %arg9[%c9, %c0_3, %c0_4] : memref<10x10x4xf32, #tpu.memory_space<vmem>>, vector<1x10x4xf32>
    tpu.vector_store %arg9[%c9, %c0_3, %c0_4], %2 {strides = array<i32>} : memref<10x10x4xf32, #tpu.memory_space<vmem>>, vector<1x10x4xf32>,
    %cst_5 = arith.constant 0.000000e+00 : f32
    %4 = vector.broadcast %cst_5 : f32 to vector<10x1x4xf32>
    %c0_6 = arith.constant 0 : index
    %c0_7 = arith.constant 0 : index
    %c0_8 = arith.constant 0 : index
    %5 = vector.load %arg9[%c0_6, %c0_7, %c0_8] : memref<10x10x4xf32, #tpu.memory_space<vmem>>, vector<10x1x4xf32>
    tpu.vector_store %arg9[%c0_6, %c0_7, %c0_8], %4 {strides = array<i32>} : memref<10x10x4xf32, #tpu.memory_space<vmem>>, vector<10x1x4xf32>,
    %cst_9 = arith.constant 0.000000e+00 : f32
    %6 = vector.broadcast %cst_9 : f32 to vector<10x1x4xf32>
    %c0_10 = arith.constant 0 : index
    %c9_11 = arith.constant 9 : index
    %c0_12 = arith.constant 0 : index
    %7 = vector.load %arg9[%c0_10, %c9_11, %c0_12] : memref<10x10x4xf32, #tpu.memory_space<vmem>>, vector<10x1x4xf32>
    tpu.vector_store %arg9[%c0_10, %c9_11, %c0_12], %6 {strides = array<i32>} : memref<10x10x4xf32, #tpu.memory_space<vmem>>, vector<10x1x4xf32>,
    %cst_13 = arith.constant 0.000000e+00 : f32
    %8 = vector.broadcast %cst_13 : f32 to vector<1x10x8xf32>
    %c0_14 = arith.constant 0 : index
    %c0_15 = arith.constant 0 : index
    %c0_16 = arith.constant 0 : index
    %9 = vector.load %arg10[%c0_14, %c0_15, %c0_16] : memref<10x10x8xf32, #tpu.memory_space<vmem>>, vector<1x10x8xf32>
    tpu.vector_store %arg10[%c0_14, %c0_15, %c0_16], %8 {strides = array<i32>} : memref<10x10x8xf32, #tpu.memory_space<vmem>>, vector<1x10x8xf32>,
    %cst_17 = arith.constant 0.000000e+00 : f32
    %10 = vector.broadcast %cst_17 : f32 to vector<1x10x8xf32>
    %c9_18 = arith.constant 9 : index
    %c0_19 = arith.constant 0 : index
    %c0_20 = arith.constant 0 : index
    %11 = vector.load %arg10[%c9_18, %c0_19, %c0_20] : memref<10x10x8xf32, #tpu.memory_space<vmem>>, vector<1x10x8xf32>
    tpu.vector_store %arg10[%c9_18, %c0_19, %c0_20], %10 {strides = array<i32>} : memref<10x10x8xf32, #tpu.memory_space<vmem>>, vector<1x10x8xf32>,
    %cst_21 = arith.constant 0.000000e+00 : f32
    %12 = vector.broadcast %cst_21 : f32 to vector<10x1x8xf32>
    %c0_22 = arith.constant 0 : index
    %c0_23 = arith.constant 0 : index
    %c0_24 = arith.constant 0 : index
    %13 = vector.load %arg10[%c0_22, %c0_23, %c0_24] : memref<10x10x8xf32, #tpu.memory_space<vmem>>, vector<10x1x8xf32>
    tpu.vector_store %arg10[%c0_22, %c0_23, %c0_24], %12 {strides = array<i32>} : memref<10x10x8xf32, #tpu.memory_space<vmem>>, vector<10x1x8xf32>,
    %cst_25 = arith.constant 0.000000e+00 : f32
    %14 = vector.broadcast %cst_25 : f32 to vector<10x1x8xf32>
    %c0_26 = arith.constant 0 : index
    %c9_27 = arith.constant 9 : index
    %c0_28 = arith.constant 0 : index
    %15 = vector.load %arg10[%c0_26, %c9_27, %c0_28] : memref<10x10x8xf32, #tpu.memory_space<vmem>>, vector<10x1x8xf32>
    tpu.vector_store %arg10[%c0_26, %c9_27, %c0_28], %14 {strides = array<i32>} : memref<10x10x8xf32, #tpu.memory_space<vmem>>, vector<10x1x8xf32>,
    %c0_29 = arith.constant 0 : index
    %c0_30 = arith.constant 0 : index
    %c0_31 = arith.constant 0 : index
    %c0_32 = arith.constant 0 : index
    %c0_33 = arith.constant 0 : index
    %c0_34 = arith.constant 0 : index
    %16 = vector.load %arg1[%c0_29, %c0_30, %c0_31, %c0_32, %c0_33, %c0_34] : memref<1x2x2x8x8x4xf32, #tpu.memory_space<vmem>>, vector<1x1x1x8x8x4xf32>
    %17 = vector.shape_cast %16 : vector<1x1x1x8x8x4xf32> to vector<8x8x4xf32>
    %c0_35 = arith.constant 0 : index
    %c0_36 = arith.constant 0 : index
    %c1 = arith.constant 1 : index
    %c0_37 = arith.constant 0 : index
    %c0_38 = arith.constant 0 : index
    %c0_39 = arith.constant 0 : index
    %18 = vector.load %arg1[%c0_35, %c0_36, %c1, %c0_37, %c0_38, %c0_39] : memref<1x2x2x8x8x4xf32, #tpu.memory_space<vmem>>, vector<1x1x1x8x8x4xf32>
    %19 = vector.shape_cast %18 : vector<1x1x1x8x8x4xf32> to vector<8x8x4xf32>
    %20 = arith.maximumf %17, %19 : vector<8x8x4xf32>
    %c0_40 = arith.constant 0 : index
    %c1_41 = arith.constant 1 : index
    %c0_42 = arith.constant 0 : index
    %c0_43 = arith.constant 0 : index
    %c0_44 = arith.constant 0 : index
    %c0_45 = arith.constant 0 : index
    %21 = vector.load %arg1[%c0_40, %c1_41, %c0_42, %c0_43, %c0_44, %c0_45] : memref<1x2x2x8x8x4xf32, #tpu.memory_space<vmem>>, vector<1x1x1x8x8x4xf32>
    %22 = vector.shape_cast %21 : vector<1x1x1x8x8x4xf32> to vector<8x8x4xf32>
    %c0_46 = arith.constant 0 : index
    %c1_47 = arith.constant 1 : index
    %c1_48 = arith.constant 1 : index
    %c0_49 = arith.constant 0 : index
    %c0_50 = arith.constant 0 : index
    %c0_51 = arith.constant 0 : index
    %23 = vector.load %arg1[%c0_46, %c1_47, %c1_48, %c0_49, %c0_50, %c0_51] : memref<1x2x2x8x8x4xf32, #tpu.memory_space<vmem>>, vector<1x1x1x8x8x4xf32>
    %24 = vector.shape_cast %23 : vector<1x1x1x8x8x4xf32> to vector<8x8x4xf32>
    %25 = arith.maximumf %22, %24 : vector<8x8x4xf32>
    %26 = arith.maximumf %20, %25 : vector<8x8x4xf32>
    %c1_52 = arith.constant 1 : index
    %c1_53 = arith.constant 1 : index
    %c0_54 = arith.constant 0 : index
    %27 = vector.load %arg9[%c1_52, %c1_53, %c0_54] : memref<10x10x4xf32, #tpu.memory_space<vmem>>, vector<8x8x4xf32>
    tpu.vector_store %arg9[%c1_52, %c1_53, %c0_54], %26 {strides = array<i32>} : memref<10x10x4xf32, #tpu.memory_space<vmem>>, vector<8x8x4xf32>,
    %28 = vector.shape_cast %26 : vector<8x8x4xf32> to vector<64x4xf32>
    %c1_55 = arith.constant 1 : index
    %c1_56 = arith.constant 1 : index
    %c0_57 = arith.constant 0 : index
    %c0_58 = arith.constant 0 : index
    %29 = vector.load %arg2[%c1_55, %c1_56, %c0_57, %c0_58] : memref<3x3x4x8xf32, #tpu.memory_space<vmem>>, vector<1x1x4x8xf32>
    %30 = vector.shape_cast %29 : vector<1x1x4x8xf32> to vector<4x8xf32>
    %cst_59 = arith.constant dense<0.000000e+00> : vector<64x8xf32>
    %31 = tpu.matmul %28, %30, %cst_59 {dimension_numbers = #tpu.dot_dimension_numbers<[1], [0], [0], [1], [0, 0, 1, 1], [], []>} : vector<64x4xf32>, vector<4x8xf32>, vector<64x8xf32> -> vector<64x8xf32>
    %c0_60 = arith.constant 0 : index
    %c0_61 = arith.constant 0 : index
    %c0_62 = arith.constant 0 : index
    %32 = vector.load %arg9[%c0_60, %c0_61, %c0_62] : memref<10x10x4xf32, #tpu.memory_space<vmem>>, vector<8x8x4xf32>
    %33 = vector.shape_cast %32 : vector<8x8x4xf32> to vector<64x4xf32>
    %c0_63 = arith.constant 0 : index
    %c0_64 = arith.constant 0 : index
    %c0_65 = arith.constant 0 : index
    %c0_66 = arith.constant 0 : index
    %34 = vector.load %arg2[%c0_63, %c0_64, %c0_65, %c0_66] : memref<3x3x4x8xf32, #tpu.memory_space<vmem>>, vector<1x1x4x8xf32>
    %35 = vector.shape_cast %34 : vector<1x1x4x8xf32> to vector<4x8xf32>
    %cst_67 = arith.constant dense<0.000000e+00> : vector<64x8xf32>
    %36 = tpu.matmul %33, %35, %cst_67 {dimension_numbers = #tpu.dot_dimension_numbers<[1], [0], [0], [1], [0, 0, 1, 1], [], []>} : vector<64x4xf32>, vector<4x8xf32>, vector<64x8xf32> -> vector<64x8xf32>
    %37 = arith.addf %31, %36 : vector<64x8xf32>
    %c0_68 = arith.constant 0 : index
    %c1_69 = arith.constant 1 : index
    %c0_70 = arith.constant 0 : index
    %38 = vector.load %arg9[%c0_68, %c1_69, %c0_70] : memref<10x10x4xf32, #tpu.memory_space<vmem>>, vector<8x8x4xf32>
    %39 = vector.shape_cast %38 : vector<8x8x4xf32> to vector<64x4xf32>
    %c0_71 = arith.constant 0 : index
    %c1_72 = arith.constant 1 : index
    %c0_73 = arith.constant 0 : index
    %c0_74 = arith.constant 0 : index
    %40 = vector.load %arg2[%c0_71, %c1_72, %c0_73, %c0_74] : memref<3x3x4x8xf32, #tpu.memory_space<vmem>>, vector<1x1x4x8xf32>
    %41 = vector.shape_cast %40 : vector<1x1x4x8xf32> to vector<4x8xf32>
    %cst_75 = arith.constant dense<0.000000e+00> : vector<64x8xf32>
    %42 = tpu.matmul %39, %41, %cst_75 {dimension_numbers = #tpu.dot_dimension_numbers<[1], [0], [0], [1], [0, 0, 1, 1], [], []>} : vector<64x4xf32>, vector<4x8xf32>, vector<64x8xf32> -> vector<64x8xf32>
    %43 = arith.addf %37, %42 : vector<64x8xf32>
    %c0_76 = arith.constant 0 : index
    %c2 = arith.constant 2 : index
    %c0_77 = arith.constant 0 : index
    %44 = vector.load %arg9[%c0_76, %c2, %c0_77] : memref<10x10x4xf32, #tpu.memory_space<vmem>>, vector<8x8x4xf32>
    %45 = vector.shape_cast %44 : vector<8x8x4xf32> to vector<64x4xf32>
    %c0_78 = arith.constant 0 : index
    %c2_79 = arith.constant 2 : index
    %c0_80 = arith.constant 0 : index
    %c0_81 = arith.constant 0 : index
    %46 = vector.load %arg2[%c0_78, %c2_79, %c0_80, %c0_81] : memref<3x3x4x8xf32, #tpu.memory_space<vmem>>, vector<1x1x4x8xf32>
    %47 = vector.shape_cast %46 : vector<1x1x4x8xf32> to vector<4x8xf32>
    %cst_82 = arith.constant dense<0.000000e+00> : vector<64x8xf32>
    %48 = tpu.matmul %45, %47, %cst_82 {dimension_numbers = #tpu.dot_dimension_numbers<[1], [0], [0], [1], [0, 0, 1, 1], [], []>} : vector<64x4xf32>, vector<4x8xf32>, vector<64x8xf32> -> vector<64x8xf32>
    %49 = arith.addf %43, %48 : vector<64x8xf32>
    %c1_83 = arith.constant 1 : index
    %c0_84 = arith.constant 0 : index
    %c0_85 = arith.constant 0 : index
    %50 = vector.load %arg9[%c1_83, %c0_84, %c0_85] : memref<10x10x4xf32, #tpu.memory_space<vmem>>, vector<8x8x4xf32>
    %51 = vector.shape_cast %50 : vector<8x8x4xf32> to vector<64x4xf32>
    %c1_86 = arith.constant 1 : index
    %c0_87 = arith.constant 0 : index
    %c0_88 = arith.constant 0 : index
    %c0_89 = arith.constant 0 : index
    %52 = vector.load %arg2[%c1_86, %c0_87, %c0_88, %c0_89] : memref<3x3x4x8xf32, #tpu.memory_space<vmem>>, vector<1x1x4x8xf32>
    %53 = vector.shape_cast %52 : vector<1x1x4x8xf32> to vector<4x8xf32>
    %cst_90 = arith.constant dense<0.000000e+00> : vector<64x8xf32>
    %54 = tpu.matmul %51, %53, %cst_90 {dimension_numbers = #tpu.dot_dimension_numbers<[1], [0], [0], [1], [0, 0, 1, 1], [], []>} : vector<64x4xf32>, vector<4x8xf32>, vector<64x8xf32> -> vector<64x8xf32>
    %55 = arith.addf %49, %54 : vector<64x8xf32>
    %c1_91 = arith.constant 1 : index
    %c2_92 = arith.constant 2 : index
    %c0_93 = arith.constant 0 : index
    %56 = vector.load %arg9[%c1_91, %c2_92, %c0_93] : memref<10x10x4xf32, #tpu.memory_space<vmem>>, vector<8x8x4xf32>
    %57 = vector.shape_cast %56 : vector<8x8x4xf32> to vector<64x4xf32>
    %c1_94 = arith.constant 1 : index
    %c2_95 = arith.constant 2 : index
    %c0_96 = arith.constant 0 : index
    %c0_97 = arith.constant 0 : index
    %58 = vector.load %arg2[%c1_94, %c2_95, %c0_96, %c0_97] : memref<3x3x4x8xf32, #tpu.memory_space<vmem>>, vector<1x1x4x8xf32>
    %59 = vector.shape_cast %58 : vector<1x1x4x8xf32> to vector<4x8xf32>
    %cst_98 = arith.constant dense<0.000000e+00> : vector<64x8xf32>
    %60 = tpu.matmul %57, %59, %cst_98 {dimension_numbers = #tpu.dot_dimension_numbers<[1], [0], [0], [1], [0, 0, 1, 1], [], []>} : vector<64x4xf32>, vector<4x8xf32>, vector<64x8xf32> -> vector<64x8xf32>
    %61 = arith.addf %55, %60 : vector<64x8xf32>
    %c2_99 = arith.constant 2 : index
    %c0_100 = arith.constant 0 : index
    %c0_101 = arith.constant 0 : index
    %62 = vector.load %arg9[%c2_99, %c0_100, %c0_101] : memref<10x10x4xf32, #tpu.memory_space<vmem>>, vector<8x8x4xf32>
    %63 = vector.shape_cast %62 : vector<8x8x4xf32> to vector<64x4xf32>
    %c2_102 = arith.constant 2 : index
    %c0_103 = arith.constant 0 : index
    %c0_104 = arith.constant 0 : index
    %c0_105 = arith.constant 0 : index
    %64 = vector.load %arg2[%c2_102, %c0_103, %c0_104, %c0_105] : memref<3x3x4x8xf32, #tpu.memory_space<vmem>>, vector<1x1x4x8xf32>
    %65 = vector.shape_cast %64 : vector<1x1x4x8xf32> to vector<4x8xf32>
    %cst_106 = arith.constant dense<0.000000e+00> : vector<64x8xf32>
    %66 = tpu.matmul %63, %65, %cst_106 {dimension_numbers = #tpu.dot_dimension_numbers<[1], [0], [0], [1], [0, 0, 1, 1], [], []>} : vector<64x4xf32>, vector<4x8xf32>, vector<64x8xf32> -> vector<64x8xf32>
    %67 = arith.addf %61, %66 : vector<64x8xf32>
    %c2_107 = arith.constant 2 : index
    %c1_108 = arith.constant 1 : index
    %c0_109 = arith.constant 0 : index
    %68 = vector.load %arg9[%c2_107, %c1_108, %c0_109] : memref<10x10x4xf32, #tpu.memory_space<vmem>>, vector<8x8x4xf32>
    %69 = vector.shape_cast %68 : vector<8x8x4xf32> to vector<64x4xf32>
    %c2_110 = arith.constant 2 : index
    %c1_111 = arith.constant 1 : index
    %c0_112 = arith.constant 0 : index
    %c0_113 = arith.constant 0 : index
    %70 = vector.load %arg2[%c2_110, %c1_111, %c0_112, %c0_113] : memref<3x3x4x8xf32, #tpu.memory_space<vmem>>, vector<1x1x4x8xf32>
    %71 = vector.shape_cast %70 : vector<1x1x4x8xf32> to vector<4x8xf32>
    %cst_114 = arith.constant dense<0.000000e+00> : vector<64x8xf32>
    %72 = tpu.matmul %69, %71, %cst_114 {dimension_numbers = #tpu.dot_dimension_numbers<[1], [0], [0], [1], [0, 0, 1, 1], [], []>} : vector<64x4xf32>, vector<4x8xf32>, vector<64x8xf32> -> vector<64x8xf32>
    %73 = arith.addf %67, %72 : vector<64x8xf32>
    %c2_115 = arith.constant 2 : index
    %c2_116 = arith.constant 2 : index
    %c0_117 = arith.constant 0 : index
    %74 = vector.load %arg9[%c2_115, %c2_116, %c0_117] : memref<10x10x4xf32, #tpu.memory_space<vmem>>, vector<8x8x4xf32>
    %75 = vector.shape_cast %74 : vector<8x8x4xf32> to vector<64x4xf32>
    %c2_118 = arith.constant 2 : index
    %c2_119 = arith.constant 2 : index
    %c0_120 = arith.constant 0 : index
    %c0_121 = arith.constant 0 : index
    %76 = vector.load %arg2[%c2_118, %c2_119, %c0_120, %c0_121] : memref<3x3x4x8xf32, #tpu.memory_space<vmem>>, vector<1x1x4x8xf32>
    %77 = vector.shape_cast %76 : vector<1x1x4x8xf32> to vector<4x8xf32>
    %cst_122 = arith.constant dense<0.000000e+00> : vector<64x8xf32>
    %78 = tpu.matmul %75, %77, %cst_122 {dimension_numbers = #tpu.dot_dimension_numbers<[1], [0], [0], [1], [0, 0, 1, 1], [], []>} : vector<64x4xf32>, vector<4x8xf32>, vector<64x8xf32> -> vector<64x8xf32>
    %79 = arith.addf %73, %78 : vector<64x8xf32>
    %c0_123 = arith.constant 0 : index
    %c0_124 = arith.constant 0 : index
    %80 = vector.load %arg3[%c0_123, %c0_124] : memref<1x8xf32, #tpu.memory_space<vmem>>, vector<1x8xf32>
    %81 = vector.broadcast %80 : vector<1x8xf32> to vector<64x8xf32>
    %82 = arith.mulf %79, %81 : vector<64x8xf32>
    %c0_125 = arith.constant 0 : index
    %c0_126 = arith.constant 0 : index
    %83 = vector.load %arg4[%c0_125, %c0_126] : memref<1x8xf32, #tpu.memory_space<vmem>>, vector<1x8xf32>
    %84 = vector.broadcast %83 : vector<1x8xf32> to vector<64x8xf32>
    %85 = arith.addf %82, %84 : vector<64x8xf32>
    %cst_127 = arith.constant 0.000000e+00 : f32
    %86 = vector.broadcast %cst_127 : f32 to vector<64x8xf32>
    %87 = arith.maximumf %85, %86 : vector<64x8xf32>
    %88 = vector.shape_cast %87 : vector<64x8xf32> to vector<8x8x8xf32>
    %c1_128 = arith.constant 1 : index
    %c1_129 = arith.constant 1 : index
    %c0_130 = arith.constant 0 : index
    %89 = vector.load %arg10[%c1_128, %c1_129, %c0_130] : memref<10x10x8xf32, #tpu.memory_space<vmem>>, vector<8x8x8xf32>
    tpu.vector_store %arg10[%c1_128, %c1_129, %c0_130], %88 {strides = array<i32>} : memref<10x10x8xf32, #tpu.memory_space<vmem>>, vector<8x8x8xf32>,
    %c1_131 = arith.constant 1 : index
    %c1_132 = arith.constant 1 : index
    %c0_133 = arith.constant 0 : index
    %c0_134 = arith.constant 0 : index
    %90 = vector.load %arg5[%c1_131, %c1_132, %c0_133, %c0_134] : memref<3x3x8x8xf32, #tpu.memory_space<vmem>>, vector<1x1x8x8xf32>
    %91 = vector.shape_cast %90 : vector<1x1x8x8xf32> to vector<8x8xf32>
    %cst_135 = arith.constant dense<0.000000e+00> : vector<64x8xf32>
    %92 = tpu.matmul %87, %91, %cst_135 {dimension_numbers = #tpu.dot_dimension_numbers<[1], [0], [0], [1], [0, 0, 1, 1], [], []>} : vector<64x8xf32>, vector<8x8xf32>, vector<64x8xf32> -> vector<64x8xf32>
    %c0_136 = arith.constant 0 : index
    %c0_137 = arith.constant 0 : index
    %c0_138 = arith.constant 0 : index
    %93 = vector.load %arg10[%c0_136, %c0_137, %c0_138] : memref<10x10x8xf32, #tpu.memory_space<vmem>>, vector<8x8x8xf32>
    %94 = vector.shape_cast %93 : vector<8x8x8xf32> to vector<64x8xf32>
    %c0_139 = arith.constant 0 : index
    %c0_140 = arith.constant 0 : index
    %c0_141 = arith.constant 0 : index
    %c0_142 = arith.constant 0 : index
    %95 = vector.load %arg5[%c0_139, %c0_140, %c0_141, %c0_142] : memref<3x3x8x8xf32, #tpu.memory_space<vmem>>, vector<1x1x8x8xf32>
    %96 = vector.shape_cast %95 : vector<1x1x8x8xf32> to vector<8x8xf32>
    %cst_143 = arith.constant dense<0.000000e+00> : vector<64x8xf32>
    %97 = tpu.matmul %94, %96, %cst_143 {dimension_numbers = #tpu.dot_dimension_numbers<[1], [0], [0], [1], [0, 0, 1, 1], [], []>} : vector<64x8xf32>, vector<8x8xf32>, vector<64x8xf32> -> vector<64x8xf32>
    %98 = arith.addf %92, %97 : vector<64x8xf32>
    %c0_144 = arith.constant 0 : index
    %c1_145 = arith.constant 1 : index
    %c0_146 = arith.constant 0 : index
    %99 = vector.load %arg10[%c0_144, %c1_145, %c0_146] : memref<10x10x8xf32, #tpu.memory_space<vmem>>, vector<8x8x8xf32>
    %100 = vector.shape_cast %99 : vector<8x8x8xf32> to vector<64x8xf32>
    %c0_147 = arith.constant 0 : index
    %c1_148 = arith.constant 1 : index
    %c0_149 = arith.constant 0 : index
    %c0_150 = arith.constant 0 : index
    %101 = vector.load %arg5[%c0_147, %c1_148, %c0_149, %c0_150] : memref<3x3x8x8xf32, #tpu.memory_space<vmem>>, vector<1x1x8x8xf32>
    %102 = vector.shape_cast %101 : vector<1x1x8x8xf32> to vector<8x8xf32>
    %cst_151 = arith.constant dense<0.000000e+00> : vector<64x8xf32>
    %103 = tpu.matmul %100, %102, %cst_151 {dimension_numbers = #tpu.dot_dimension_numbers<[1], [0], [0], [1], [0, 0, 1, 1], [], []>} : vector<64x8xf32>, vector<8x8xf32>, vector<64x8xf32> -> vector<64x8xf32>
    %104 = arith.addf %98, %103 : vector<64x8xf32>
    %c0_152 = arith.constant 0 : index
    %c2_153 = arith.constant 2 : index
    %c0_154 = arith.constant 0 : index
    %105 = vector.load %arg10[%c0_152, %c2_153, %c0_154] : memref<10x10x8xf32, #tpu.memory_space<vmem>>, vector<8x8x8xf32>
    %106 = vector.shape_cast %105 : vector<8x8x8xf32> to vector<64x8xf32>
    %c0_155 = arith.constant 0 : index
    %c2_156 = arith.constant 2 : index
    %c0_157 = arith.constant 0 : index
    %c0_158 = arith.constant 0 : index
    %107 = vector.load %arg5[%c0_155, %c2_156, %c0_157, %c0_158] : memref<3x3x8x8xf32, #tpu.memory_space<vmem>>, vector<1x1x8x8xf32>
    %108 = vector.shape_cast %107 : vector<1x1x8x8xf32> to vector<8x8xf32>
    %cst_159 = arith.constant dense<0.000000e+00> : vector<64x8xf32>
    %109 = tpu.matmul %106, %108, %cst_159 {dimension_numbers = #tpu.dot_dimension_numbers<[1], [0], [0], [1], [0, 0, 1, 1], [], []>} : vector<64x8xf32>, vector<8x8xf32>, vector<64x8xf32> -> vector<64x8xf32>
    %110 = arith.addf %104, %109 : vector<64x8xf32>
    %c1_160 = arith.constant 1 : index
    %c0_161 = arith.constant 0 : index
    %c0_162 = arith.constant 0 : index
    %111 = vector.load %arg10[%c1_160, %c0_161, %c0_162] : memref<10x10x8xf32, #tpu.memory_space<vmem>>, vector<8x8x8xf32>
    %112 = vector.shape_cast %111 : vector<8x8x8xf32> to vector<64x8xf32>
    %c1_163 = arith.constant 1 : index
    %c0_164 = arith.constant 0 : index
    %c0_165 = arith.constant 0 : index
    %c0_166 = arith.constant 0 : index
    %113 = vector.load %arg5[%c1_163, %c0_164, %c0_165, %c0_166] : memref<3x3x8x8xf32, #tpu.memory_space<vmem>>, vector<1x1x8x8xf32>
    %114 = vector.shape_cast %113 : vector<1x1x8x8xf32> to vector<8x8xf32>
    %cst_167 = arith.constant dense<0.000000e+00> : vector<64x8xf32>
    %115 = tpu.matmul %112, %114, %cst_167 {dimension_numbers = #tpu.dot_dimension_numbers<[1], [0], [0], [1], [0, 0, 1, 1], [], []>} : vector<64x8xf32>, vector<8x8xf32>, vector<64x8xf32> -> vector<64x8xf32>
    %116 = arith.addf %110, %115 : vector<64x8xf32>
    %c1_168 = arith.constant 1 : index
    %c2_169 = arith.constant 2 : index
    %c0_170 = arith.constant 0 : index
    %117 = vector.load %arg10[%c1_168, %c2_169, %c0_170] : memref<10x10x8xf32, #tpu.memory_space<vmem>>, vector<8x8x8xf32>
    %118 = vector.shape_cast %117 : vector<8x8x8xf32> to vector<64x8xf32>
    %c1_171 = arith.constant 1 : index
    %c2_172 = arith.constant 2 : index
    %c0_173 = arith.constant 0 : index
    %c0_174 = arith.constant 0 : index
    %119 = vector.load %arg5[%c1_171, %c2_172, %c0_173, %c0_174] : memref<3x3x8x8xf32, #tpu.memory_space<vmem>>, vector<1x1x8x8xf32>
    %120 = vector.shape_cast %119 : vector<1x1x8x8xf32> to vector<8x8xf32>
    %cst_175 = arith.constant dense<0.000000e+00> : vector<64x8xf32>
    %121 = tpu.matmul %118, %120, %cst_175 {dimension_numbers = #tpu.dot_dimension_numbers<[1], [0], [0], [1], [0, 0, 1, 1], [], []>} : vector<64x8xf32>, vector<8x8xf32>, vector<64x8xf32> -> vector<64x8xf32>
    %122 = arith.addf %116, %121 : vector<64x8xf32>
    %c2_176 = arith.constant 2 : index
    %c0_177 = arith.constant 0 : index
    %c0_178 = arith.constant 0 : index
    %123 = vector.load %arg10[%c2_176, %c0_177, %c0_178] : memref<10x10x8xf32, #tpu.memory_space<vmem>>, vector<8x8x8xf32>
    %124 = vector.shape_cast %123 : vector<8x8x8xf32> to vector<64x8xf32>
    %c2_179 = arith.constant 2 : index
    %c0_180 = arith.constant 0 : index
    %c0_181 = arith.constant 0 : index
    %c0_182 = arith.constant 0 : index
    %125 = vector.load %arg5[%c2_179, %c0_180, %c0_181, %c0_182] : memref<3x3x8x8xf32, #tpu.memory_space<vmem>>, vector<1x1x8x8xf32>
    %126 = vector.shape_cast %125 : vector<1x1x8x8xf32> to vector<8x8xf32>
    %cst_183 = arith.constant dense<0.000000e+00> : vector<64x8xf32>
    %127 = tpu.matmul %124, %126, %cst_183 {dimension_numbers = #tpu.dot_dimension_numbers<[1], [0], [0], [1], [0, 0, 1, 1], [], []>} : vector<64x8xf32>, vector<8x8xf32>, vector<64x8xf32> -> vector<64x8xf32>
    %128 = arith.addf %122, %127 : vector<64x8xf32>
    %c2_184 = arith.constant 2 : index
    %c1_185 = arith.constant 1 : index
    %c0_186 = arith.constant 0 : index
    %129 = vector.load %arg10[%c2_184, %c1_185, %c0_186] : memref<10x10x8xf32, #tpu.memory_space<vmem>>, vector<8x8x8xf32>
    %130 = vector.shape_cast %129 : vector<8x8x8xf32> to vector<64x8xf32>
    %c2_187 = arith.constant 2 : index
    %c1_188 = arith.constant 1 : index
    %c0_189 = arith.constant 0 : index
    %c0_190 = arith.constant 0 : index
    %131 = vector.load %arg5[%c2_187, %c1_188, %c0_189, %c0_190] : memref<3x3x8x8xf32, #tpu.memory_space<vmem>>, vector<1x1x8x8xf32>
    %132 = vector.shape_cast %131 : vector<1x1x8x8xf32> to vector<8x8xf32>
    %cst_191 = arith.constant dense<0.000000e+00> : vector<64x8xf32>
    %133 = tpu.matmul %130, %132, %cst_191 {dimension_numbers = #tpu.dot_dimension_numbers<[1], [0], [0], [1], [0, 0, 1, 1], [], []>} : vector<64x8xf32>, vector<8x8xf32>, vector<64x8xf32> -> vector<64x8xf32>
    %134 = arith.addf %128, %133 : vector<64x8xf32>
    %c2_192 = arith.constant 2 : index
    %c2_193 = arith.constant 2 : index
    %c0_194 = arith.constant 0 : index
    %135 = vector.load %arg10[%c2_192, %c2_193, %c0_194] : memref<10x10x8xf32, #tpu.memory_space<vmem>>, vector<8x8x8xf32>
    %136 = vector.shape_cast %135 : vector<8x8x8xf32> to vector<64x8xf32>
    %c2_195 = arith.constant 2 : index
    %c2_196 = arith.constant 2 : index
    %c0_197 = arith.constant 0 : index
    %c0_198 = arith.constant 0 : index
    %137 = vector.load %arg5[%c2_195, %c2_196, %c0_197, %c0_198] : memref<3x3x8x8xf32, #tpu.memory_space<vmem>>, vector<1x1x8x8xf32>
    %138 = vector.shape_cast %137 : vector<1x1x8x8xf32> to vector<8x8xf32>
    %cst_199 = arith.constant dense<0.000000e+00> : vector<64x8xf32>
    %139 = tpu.matmul %136, %138, %cst_199 {dimension_numbers = #tpu.dot_dimension_numbers<[1], [0], [0], [1], [0, 0, 1, 1], [], []>} : vector<64x8xf32>, vector<8x8xf32>, vector<64x8xf32> -> vector<64x8xf32>
    %140 = arith.addf %134, %139 : vector<64x8xf32>
    %c0_200 = arith.constant 0 : index
    %c0_201 = arith.constant 0 : index
    %141 = vector.load %arg6[%c0_200, %c0_201] : memref<1x8xf32, #tpu.memory_space<vmem>>, vector<1x8xf32>
    %142 = vector.broadcast %141 : vector<1x8xf32> to vector<64x8xf32>
    %143 = arith.mulf %140, %142 : vector<64x8xf32>
    %c0_202 = arith.constant 0 : index
    %c0_203 = arith.constant 0 : index
    %144 = vector.load %arg7[%c0_202, %c0_203] : memref<1x8xf32, #tpu.memory_space<vmem>>, vector<1x8xf32>
    %145 = vector.broadcast %144 : vector<1x8xf32> to vector<64x8xf32>
    %146 = arith.addf %143, %145 : vector<64x8xf32>
    %cst_204 = arith.constant 0.000000e+00 : f32
    %147 = vector.broadcast %cst_204 : f32 to vector<64x8xf32>
    %148 = arith.maximumf %146, %147 : vector<64x8xf32>
    %149 = vector.shape_cast %148 : vector<64x8xf32> to vector<8x8x8xf32>
    %c0_205 = arith.constant 0 : index
    %c0_206 = arith.constant 0 : index
    %c0_207 = arith.constant 0 : index
    %c0_208 = arith.constant 0 : index
    %150 = vector.load %arg8[%c0_205, %c0_206, %c0_207, %c0_208] : memref<1x8x8x8xf32, #tpu.memory_space<vmem>>, vector<1x8x8x8xf32>
    %151 = vector.shape_cast %150 : vector<1x8x8x8xf32> to vector<8x8x8xf32>
    %152 = vector.shape_cast %149 : vector<8x8x8xf32> to vector<1x8x8x8xf32>
    tpu.vector_store %arg8[%c0_205, %c0_206, %c0_207, %c0_208], %152 {strides = array<i32>} : memref<1x8x8x8xf32, #tpu.memory_space<vmem>>, vector<1x8x8x8xf32>,
    return
  }
  func.func @transform_0(%arg0: i32) -> (i32, i32, i32, i32, i32, i32) {
    %c0_i32 = arith.constant 0 : i32
    %c0_i32_0 = arith.constant 0 : i32
    %c0_i32_1 = arith.constant 0 : i32
    %c0_i32_2 = arith.constant 0 : i32
    %c0_i32_3 = arith.constant 0 : i32
    %c0_i32_4 = arith.constant 0 : i32
    return %arg0, %c0_i32, %c0_i32_0, %c0_i32_1, %c0_i32_2, %c0_i32_3 : i32, i32, i32, i32, i32, i32
  }
  func.func @transform_1(%arg0: i32) -> (i32, i32, i32, i32) {
    %c0_i32 = arith.constant 0 : i32
    %c0_i32_0 = arith.constant 0 : i32
    %c0_i32_1 = arith.constant 0 : i32
    %c0_i32_2 = arith.constant 0 : i32
    %c0_i32_3 = arith.constant 0 : i32
    return %c0_i32, %c0_i32_0, %c0_i32_1, %c0_i32_2 : i32, i32, i32, i32
  }
  func.func @transform_2(%arg0: i32) -> (i32, i32) {
    %c0_i32 = arith.constant 0 : i32
    %c0_i32_0 = arith.constant 0 : i32
    %c0_i32_1 = arith.constant 0 : i32
    return %c0_i32, %c0_i32_0 : i32, i32
  }
  func.func @transform_3(%arg0: i32) -> (i32, i32) {
    %c0_i32 = arith.constant 0 : i32
    %c0_i32_0 = arith.constant 0 : i32
    %c0_i32_1 = arith.constant 0 : i32
    return %c0_i32, %c0_i32_0 : i32, i32
  }
  func.func @transform_4(%arg0: i32) -> (i32, i32, i32, i32) {
    %c0_i32 = arith.constant 0 : i32
    %c0_i32_0 = arith.constant 0 : i32
    %c0_i32_1 = arith.constant 0 : i32
    %c0_i32_2 = arith.constant 0 : i32
    %c0_i32_3 = arith.constant 0 : i32
    return %c0_i32, %c0_i32_0, %c0_i32_1, %c0_i32_2 : i32, i32, i32, i32
  }
  func.func @transform_5(%arg0: i32) -> (i32, i32) {
    %c0_i32 = arith.constant 0 : i32
    %c0_i32_0 = arith.constant 0 : i32
    %c0_i32_1 = arith.constant 0 : i32
    return %c0_i32, %c0_i32_0 : i32, i32
  }
  func.func @transform_6(%arg0: i32) -> (i32, i32) {
    %c0_i32 = arith.constant 0 : i32
    %c0_i32_0 = arith.constant 0 : i32
    %c0_i32_1 = arith.constant 0 : i32
    return %c0_i32, %c0_i32_0 : i32, i32
  }
  func.func @transform_7(%arg0: i32) -> (i32, i32, i32, i32) {
    %c0_i32 = arith.constant 0 : i32
    %c0_i32_0 = arith.constant 0 : i32
    %c0_i32_1 = arith.constant 0 : i32
    %c0_i32_2 = arith.constant 0 : i32
    return %arg0, %c0_i32, %c0_i32_0, %c0_i32_1 : i32, i32, i32, i32
  }
}

</mosaic_0001>

<bundles_post_ra>
// kernel: tpu_custom_call.1
= control target key start
LH: loop header
LB: loop body
LE: loop exit
PB: predicated region body
PF: predicated region fallthrough
CT: control target
= control target key end

     0   :  { %12 = vsyncpa [#allocation5], 0  ;;  %s4724_s0 = inlined_call_operand.vmem [shape: f32[2,2,2,8,8,4], index: 0, kind: input, shape index: {}]   ;;  %s4725_s1 = inlined_call_operand.vmem [shape: f32[3,3,4,8], index: 1, kind: input, shape index: {}]   ;;  %s4726_s2 = inlined_call_operand.vmem [shape: f32[1,8], index: 2, kind: input, shape index: {}]   ;;  %s4727_s3 = inlined_call_operand.vmem [shape: f32[1,8], index: 3, kind: input, shape index: {}]   ;;  %s4728_s4 = inlined_call_operand.vmem [shape: f32[3,3,8,8], index: 4, kind: input, shape index: {}]   ;;  %s4729_s5 = inlined_call_operand.vmem [shape: f32[1,8], index: 5, kind: input, shape index: {}]   ;;  %s4730_s6 = inlined_call_operand.vmem [shape: f32[1,8], index: 6, kind: input, shape index: {}]   ;;  %s4731_s7 = inlined_call_operand.hbm [shape: f32[2,8,8,8], index: 7, kind: output, shape index: {}]  }
   0x1   :  { %14 = vsyncpa [#allocation5 + $0x1], 0  ;;  %s4099_s24 = smov 0   ;;  %s4101_s25 = smov 0  }
   0x2   :  { %s4103_s26 = smov 0   ;;  %s4105_s27 = smov 0  }
   0x3 LB: > { %s4120_s28 = sadd.s32 4294967295, %s4053_s27   ;;  %s3196_s29 = sadd.s32 4294967294, %s4053_s27   ;;  %s4053_s27 = sphi %s4105_s27, %s4737_s27   ;;  %s4049_s26 = sphi %s4103_s26, %s4736_s26   ;;  %s4045_s25 = sphi %s4101_s25, %s4735_s25   ;;  %s4041_s24 = sphi %s4099_s24, %s4734_s24  }
   0x4   : > { %s4124_s30 = sadd.s32 1, %s4053_s27   ;;  %s179_s8 = sadd.s32 1, %s4049_s26 }
   0x5   : > { %s176_s9 = ssub.s32 %s4053_s27, %s4124_s30  ;;  %p189_p0 = scmp.ne.s32.totalorder %s4049_s26, %s4045_s25 }
   0x6   : > { %p177_p1 = scmp.eq.s32.totalorder %s176_s9, 0  ;;  %p190_p2 = scmp.eq.s32.totalorder %s4120_s28, 1 }
   0x7   : > { %p195_p3 = scmp.ne.s32.totalorder %s4045_s25, %s4041_s24  ;;  %p196_p4 = scmp.eq.s32.totalorder %s3196_s29, 1 }
   0x8   : > { %s4135_s10 = scalar_select %p177_p1, %s4049_s26, %s179_s8  }
   0x9   : > { %p4137_p5 = por %p190_p2, %p189_p0  ;;  %p4141_p6 = por %p196_p4, %p195_p3 }
   0xa   : > { %p3199_p7 = scmp.ge.s32.totalorder %s4053_s27, 1  ;;  %p240_p8 = scmp.lt.s32.totalorder %s4053_s27, 3 }
   0xc   : > { %p241_p9 = pnand %p3199_p7, %p240_p8 }
   0xd   : > { %v411_v0 = vld [vmem:[%s4725_s1] sm:$0xf] (!%p241_p9)  ;;  %vm436_vm0 = vcmask (!%p241_p9), 1043456   ;;  %vm277_vm1 = vcmask (!%p241_p9), 31744   ;;  %vm284_vm2 = vcmask (!%p241_p9), 24576   ;;  %v4055_v1 = vmov (!%p241_p9), 0.0  }
   0xe   : > { %244 = sbr.rel (%p241_p9) target bundleno = 770 (0x302), region = 48  ;;  %3569 = vmatprep.subr.msk.mxu0 (!%p241_p9), %vm436_vm0, %v411_v0  ;;  %278 = vst.msk [vmem:[#allocation2] sm:$0xff] (!%p241_p9), %vm277_vm1, %v4055_v1  ;;  %282 = vst.msk [vmem:[#allocation2 + $0x90] sm:$0xff] (!%p241_p9), %vm277_vm1, %v4055_v1  ;;  %v4190_v2 = vld [vmem:[%s4725_s1 + $0x10] sm:$0xf] (!%p241_p9)  ;;  %p272_p10 = scmp.lt.s32.totalorder (!%p241_p9), %s4120_s28, 1 }
   0xf   : > { %286 = vst.msk [vmem:[#allocation2 + $0x10] sm:$0x1] (!%p241_p9), %vm284_vm2, %v4055_v1  ;;  %287 = vst.msk [vmem:[#allocation2 + $0x20] sm:$0x1] (!%p241_p9), %vm284_vm2, %v4055_v1  ;;  %vm279_vm3 = vcmask (!%p241_p9), 25600   ;;  %3570 = vmatpush3.msk.msra.mxu0 (!%p241_p9), %vm436_vm0, %v411_v0  ;;  %vm305_vm4 = vcmask (!%p241_p9), 64512  }
  0x10   : > { %288 = vst.msk [vmem:[#allocation2 + $0x30] sm:$0x1] (!%p241_p9), %vm284_vm2, %v4055_v1  ;;  %289 = vst.msk [vmem:[#allocation2 + $0x40] sm:$0x1] (!%p241_p9), %vm284_vm2, %v4055_v1  ;;  %3583 = vmatprep.subr.msk.mxu0 (!%p241_p9), %vm436_vm0, %v4190_v2  ;;  %v3246_v60 = vld [vmem:[%s4725_s1 + $0x4] sm:$0xf] (!%p241_p9) }
  0x11   : > { %290 = vst.msk [vmem:[#allocation2 + $0x50] sm:$0x1] (!%p241_p9), %vm284_vm2, %v4055_v1  ;;  %291 = vst.msk [vmem:[#allocation2 + $0x60] sm:$0x1] (!%p241_p9), %vm284_vm2, %v4055_v1  ;;  %vm312_vm5 = vcmask (!%p241_p9), 57344   ;;  %vm307_vm6 = vcmask (!%p241_p9), 58368  }
  0x12   : > { %292 = vst.msk [vmem:[#allocation2 + $0x70] sm:$0x1] (!%p241_p9), %vm284_vm2, %v4055_v1  ;;  %293 = vst.msk [vmem:[#allocation2 + $0x80] sm:$0x1] (!%p241_p9), %vm284_vm2, %v4055_v1  ;;  %s269_s16 = sand.u32 (!%p241_p9), 1, %s4045_s25   ;;  %s3406_s23 = sshll.u32 (!%p241_p9), %s4120_s28, 10 }
  0x13   : > { %296 = vst.msk [vmem:[#allocation2 + $0x19] sm:$0x1] (!%p241_p9), %vm284_vm2, %v4055_v1  ;;  %297 = vst.msk [vmem:[#allocation2 + $0x29] sm:$0x1] (!%p241_p9), %vm284_vm2, %v4055_v1  ;;  %s4673_s13 = scalar_lea.hbm (!%p241_p9), %s4731_s7, %s3406_s23  ;;  %s4056_s15 = smov (!%p241_p9), [#allocation4]  }
  0x14   : > { %298 = vst.msk [vmem:[#allocation2 + $0x39] sm:$0x1] (!%p241_p9), %vm284_vm2, %v4055_v1  ;;  %299 = vst.msk [vmem:[#allocation2 + $0x49] sm:$0x1] (!%p241_p9), %vm284_vm2, %v4055_v1 }
  0x15   : > { %300 = vst.msk [vmem:[#allocation2 + $0x59] sm:$0x1] %vm284_vm2, %v4055_v1  ;;  %301 = vst.msk [vmem:[#allocation2 + $0x69] sm:$0x1] %vm284_vm2, %v4055_v1  ;;  %s273_s17 = scalar_select %p272_p10, %s4120_s28, 1 }
  0x16   : > { %302 = vst.msk [vmem:[#allocation2 + $0x79] sm:$0x1] %vm284_vm2, %v4055_v1  ;;  %303 = vst.msk [vmem:[#allocation2 + $0x89] sm:$0x1] %vm284_vm2, %v4055_v1  ;;  %s4683_s28 = scalar_lea.sflag [#allocation5], %s269_s16 }
  0x17   : > { %285 = vst.msk [vmem:[#allocation2] sm:$0x1] %vm284_vm2, %v4055_v1  ;;  %294 = vst.msk [vmem:[#allocation2 + $0x90] sm:$0x1] %vm284_vm2, %v4055_v1  ;;  %s3405_s18 = sshll.u32 %s273_s17, 8  ;;  %s3995_s17 = sshll.u32 %s4056_s15, 4  ;;  %s3996_s17 = int_to_ptr.vmem [resolvable:$false] %s3995_s17 }
  0x18   : > { %280 = vst.msk [vmem:[#allocation2 + $0x8] sm:$0x3] %vm279_vm3, %v4055_v1  ;;  %283 = vst.msk [vmem:[#allocation2 + $0x98] sm:$0x3] %vm279_vm3, %v4055_v1  ;;  %s4210_s21 = scalar_lea.vmem %s4724_s0, %s3405_s18  ;;  %s3997_s18 = scalar_lea.vmem %s3996_s17, 2048 }
  0x19   : > { %295 = vst.msk [vmem:[#allocation2 + $0x9] sm:$0x1] %vm284_vm2, %v4055_v1  ;;  %304 = vst.msk [vmem:[#allocation2 + $0x99] sm:$0x1] %vm284_vm2, %v4055_v1  ;;  %v333_v3 = vld [vmem:[%s4210_s21] sm:$0xff]  ;;  %v334_v8 = vld [vmem:[%s4210_s21 + $0x8] sm:$0xff] }
  0x1a   : > { %v3203_v4 = vld [vmem:[%s4210_s21 + $0x40] sm:$0xff]  ;;  %v3204_v9 = vld [vmem:[%s4210_s21 + $0x48] sm:$0xff]  ;;  %v335_v16 = vld [vmem:[%s4210_s21 + $0x10] sm:$0xff]  ;;  %306 = vst.msk [vmem:[#allocation3] sm:$0xff] %vm305_vm4, %v4055_v1 }
  0x1b   : > { %v3211_v5 = vld [vmem:[%s4210_s21 + $0x80] sm:$0xff]  ;;  %v350_v6 = vmax.f32 %v333_v3, %v3203_v4  ;;  %v351_v12 = vmax.f32 %v334_v8, %v3204_v9  ;;  %v3212_v13 = vld [vmem:[%s4210_s21 + $0x88] sm:$0xff]  ;;  %v3205_v17 = vld [vmem:[%s4210_s21 + $0x50] sm:$0xff]  ;;  %310 = vst.msk [vmem:[#allocation3 + $0x90] sm:$0xff] %vm305_vm4, %v4055_v1 }
  0x1c   : > { %v3219_v7 = vld [vmem:[%s4210_s21 + $0xc0] sm:$0xff]  ;;  %v3220_v14 = vld [vmem:[%s4210_s21 + $0xc8] sm:$0xff]  ;;  %v3213_v18 = vld [vmem:[%s4210_s21 + $0x90] sm:$0xff]  ;;  %v352_v20 = vmax.f32 %v335_v16, %v3205_v17  ;;  %313 = vst.msk [vmem:[#allocation3] sm:$0x1] %vm312_vm5, %v4055_v1 }
  0x1d   : > { %v376_v11 = vmax.f32 %v3211_v5, %v3219_v7  ;;  %v377_v15 = vmax.f32 %v3212_v13, %v3220_v14  ;;  %v3221_v21 = vld [vmem:[%s4210_s21 + $0xd0] sm:$0xff]  ;;  %v336_v22 = vld [vmem:[%s4210_s21 + $0x18] sm:$0xff]  ;;  %v337_v29 = vld [vmem:[%s4210_s21 + $0x20] sm:$0xff]  ;;  %314 = vst.msk [vmem:[#allocation3 + $0x10] sm:$0x1] %vm312_vm5, %v4055_v1 }
  0x1e   : > { %v403_v10 = vld [vmem:[#allocation2] sm:$0xff]  ;;  %v3206_v23 = vld [vmem:[%s4210_s21 + $0x58] sm:$0xff]  ;;  %v378_v25 = vmax.f32 %v3213_v18, %v3221_v21  ;;  %v338_v37 = vld [vmem:[%s4210_s21 + $0x28] sm:$0xff]  ;;  %315 = vst.msk [vmem:[#allocation3 + $0x20] sm:$0x1] %vm312_vm5, %v4055_v1 }
  0x1f   : > { %3571 = vmatprep.mubr.msk.f32.mxu0 %vm277_vm1, %v403_v10  ;;  %v4224_v19 = vmax.f32 %v350_v6, %v376_v11  ;;  %v4229_v24 = vmax.f32 %v351_v12, %v377_v15  ;;  %v353_v26 = vmax.f32 %v336_v22, %v3206_v23  ;;  %v3214_v27 = vld [vmem:[%s4210_s21 + $0x98] sm:$0xff]  ;;  %v3207_v31 = vld [vmem:[%s4210_s21 + $0x60] sm:$0xff]  ;;  %v3208_v38 = vld [vmem:[%s4210_s21 + $0x68] sm:$0xff]  ;;  %316 = vst.msk [vmem:[#allocation3 + $0x30] sm:$0x1] %vm312_vm5, %v4055_v1 }
  0x20   : > { %v3222_v28 = vld [vmem:[%s4210_s21 + $0xd8] sm:$0xff]  ;;  %v3215_v32 = vld [vmem:[%s4210_s21 + $0xa0] sm:$0xff]  ;;  %v386_v34 = vmax.f32 %v352_v20, %v378_v25  ;;  %v354_v35 = vmax.f32 %v337_v29, %v3207_v31  ;;  %v3216_v39 = vld [vmem:[%s4210_s21 + $0xa8] sm:$0xff]  ;;  %v355_v41 = vmax.f32 %v338_v37, %v3208_v38  ;;  %317 = vst.msk [vmem:[#allocation3 + $0x40] sm:$0x1] %vm312_vm5, %v4055_v1 }
  0x21   : > { %393 = vst.msk [vmem:[#allocation2 + $0x11] sm:$0xff] %vm277_vm1, %v4224_v19  ;;  %v379_v30 = vmax.f32 %v3214_v27, %v3222_v28  ;;  %v3223_v33 = vld [vmem:[%s4210_s21 + $0xe0] sm:$0xff]  ;;  %394 = vst.msk [vmem:[#allocation2 + $0x21] sm:$0xff] %vm277_vm1, %v4229_v24  ;;  %v3224_v42 = vld [vmem:[%s4210_s21 + $0xe8] sm:$0xff] }
  0x22   : > { %v380_v36 = vmax.f32 %v3215_v32, %v3223_v33  ;;  %v339_v43 = vld [vmem:[%s4210_s21 + $0x30] sm:$0xff]  ;;  %395 = vst.msk [vmem:[#allocation2 + $0x31] sm:$0xff] %vm277_vm1, %v386_v34  ;;  %v381_v46 = vmax.f32 %v3216_v39, %v3224_v42  ;;  %v340_v50 = vld [vmem:[%s4210_s21 + $0x38] sm:$0xff]  ;;  %v3256_v5 = vld [vmem:[%s4725_s1 + $0x8] sm:$0xf] }
  0x23   : > { %v387_v40 = vmax.f32 %v353_v26, %v379_v30  ;;  %v3209_v44 = vld [vmem:[%s4210_s21 + $0x70] sm:$0xff]  ;;  %v3210_v52 = vld [vmem:[%s4210_s21 + $0x78] sm:$0xff]  ;;  %v677_v6 = vld [vmem:[#allocation2 + $0x1] sm:$0xff]  ;;  %318 = vst.msk [vmem:[#allocation3 + $0x50] sm:$0x1] %vm312_vm5, %v4055_v1 }
  0x24   : > { %v388_v45 = vmax.f32 %v354_v35, %v380_v36  ;;  %v356_v47 = vmax.f32 %v339_v43, %v3209_v44  ;;  %v3217_v48 = vld [vmem:[%s4210_s21 + $0xb0] sm:$0xff]  ;;  %v3218_v53 = vld [vmem:[%s4210_s21 + $0xb8] sm:$0xff]  ;;  %v389_v55 = vmax.f32 %v355_v41, %v381_v46  ;;  %v357_v56 = vmax.f32 %v340_v50, %v3210_v52  ;;  %v3266_v9 = vld [vmem:[%s4725_s1 + $0xc] sm:$0xf]  ;;  %319 = vst.msk [vmem:[#allocation3 + $0x60] sm:$0x1] %vm312_vm5, %v4055_v1 }
  0x25   : > { %v3225_v49 = vld [vmem:[%s4210_s21 + $0xf0] sm:$0xff]  ;;  %396 = vst.msk [vmem:[#allocation2 + $0x41] sm:$0xff] %vm277_vm1, %v387_v40  ;;  %v3226_v54 = vld [vmem:[%s4210_s21 + $0xf8] sm:$0xff]  ;;  %v827_v15 = vld [vmem:[#allocation2 + $0x2] sm:$0xff]  ;;  %s3200_s21 = sshll.u32 %s269_s16, 6 }
  0x26   : > { %v382_v51 = vmax.f32 %v3217_v48, %v3225_v49  ;;  %397 = vst.msk [vmem:[#allocation2 + $0x51] sm:$0xff] %vm277_vm1, %v388_v45  ;;  %v383_v57 = vmax.f32 %v3218_v53, %v3226_v54  ;;  %398 = vst.msk [vmem:[#allocation2 + $0x61] sm:$0xff] %vm277_vm1, %v389_v55  ;;  %v3276_v18 = vld [vmem:[%s4725_s1 + $0x14] sm:$0xf]  ;;  %v3296_v26 = vld [vmem:[%s4725_s1 + $0x1c] sm:$0xf] }
  0x27   : > { %v3306_v28 = vld [vmem:[%s4725_s1 + $0x20] sm:$0xf]  ;;  %v1285_v29 = vld [vmem:[#allocation2 + $0x90] sm:$0xff]  ;;  %320 = vst.msk [vmem:[#allocation3 + $0x70] sm:$0x1] %vm312_vm5, %v4055_v1  ;;  %s4654_s22 = scalar_lea.vmem [#allocation4], %s3200_s21 }
  0x28   : > { %v390_v58 = vmax.f32 %v356_v47, %v382_v51  ;;  %v4256_v59 = vld [vmem:[#allocation2 + $0x10] sm:$0xff]  ;;  %v391_v61 = vmax.f32 %v357_v56, %v383_v57  ;;  %v4264_v62 = vld [vmem:[#allocation2 + $0x20] sm:$0xff]  ;;  %321 = vst.msk [vmem:[#allocation3 + $0x80] sm:$0x1] %vm312_vm5, %v4055_v1  ;;  %322 = vst.msk [vmem:[#allocation3 + $0x90] sm:$0x1] %vm312_vm5, %v4055_v1 }
  0x29   : > { %3572 = vmatmul.mubr.msk.f32.vlgmr.msra.gmra.mrb[0].mxu0 %vm277_vm1, %v4256_v59  ;;  %v4272_v63 = vld [vmem:[#allocation2 + $0x30] sm:$0xff]  ;;  %v4313_v8 = vld [vmem:[#allocation2 + $0x21] sm:$0xff]  ;;  %324 = vst.msk [vmem:[#allocation3 + $0x19] sm:$0x1] %vm312_vm5, %v4055_v1  ;;  %325 = vst.msk [vmem:[#allocation3 + $0x29] sm:$0x1] %vm312_vm5, %v4055_v1 }
  0x2a   : > { %399 = vst.msk [vmem:[#allocation2 + $0x71] sm:$0xff] %vm277_vm1, %v390_v58  ;;  %3584 = vmatpush3.msk.msra.mxu0 %vm436_vm0, %v4190_v2  ;;  %3574 = vmatprep.mubr.msk.f32.mxu0 %vm277_vm1, %v4264_v62  ;;  %400 = vst.msk [vmem:[#allocation2 + $0x81] sm:$0xff] %vm277_vm1, %v391_v61  ;;  %v678_v7 = vld [vmem:[#allocation2 + $0x11] sm:$0xff]  ;;  %v4344_v17 = vld [vmem:[#allocation2 + $0x22] sm:$0xff]  ;;  %s3134_s29 = sshll.u32 %s4654_s22, 4  ;;  %s4675_s29 = int_to_ptr.vmem [resolvable:$true] %s3134_s29 }
  0x2b   : > { %3597 = vmatprep.subr.msk.mxu0 %vm436_vm0, %v3246_v60  ;;  %v4322_v10 = vld [vmem:[#allocation2 + $0x31] sm:$0xff]  ;;  %326 = vst.msk [vmem:[#allocation3 + $0x39] sm:$0x1] %vm312_vm5, %v4055_v1  ;;  %327 = vst.msk [vmem:[#allocation3 + $0x49] sm:$0x1] %vm312_vm5, %v4055_v1  ;;  %v1785_v33 = vld [vmem:[%s4728_s4] sm:$0xff]  ;;  %p3998_p0 = scmp.lt.s32.totalorder %s4675_s29, %s3996_s17 }
  0x2c   : > { %v4275_v0 = vld [vmem:[#allocation2 + $0x40] sm:$0xff]  ;;  %v828_v16 = vld [vmem:[#allocation2 + $0x12] sm:$0xff]  ;;  %328 = vst.msk [vmem:[#allocation3 + $0x59] sm:$0x1] %vm312_vm5, %v4055_v1  ;;  %329 = vst.msk [vmem:[#allocation3 + $0x69] sm:$0x1] %vm312_vm5, %v4055_v1  ;;  %3695 = vmatprep.subr.mxu1 %v1785_v33 }
  0x2d   : > { %3575 = vmatmul.mubr.msk.f32.gmra.mrb[2].mxu0 %vm277_vm1, %v4272_v63  ;;  %v4281_v3 = vld [vmem:[#allocation2 + $0x50] sm:$0xff]  ;;  %v4283_v2 = vld [vmem:[#allocation2 + $0x60] sm:$0xff]  ;;  %330 = vst.msk [vmem:[#allocation3 + $0x79] sm:$0x1] %vm312_vm5, %v4055_v1  ;;  %331 = vst.msk [vmem:[#allocation3 + $0x89] sm:$0x1] %vm312_vm5, %v4055_v1  ;;  %3696 = vmatpush3.msra.mxu1 %v1785_v33 }
  0x2e   : > { %3577 = vmatprep.mubr.msk.f32.mxu0 %vm277_vm1, %v4275_v0  ;;  %v4324_v11 = vld [vmem:[#allocation2 + $0x41] sm:$0xff]  ;;  %v4331_v12 = vld [vmem:[#allocation2 + $0x51] sm:$0xff]  ;;  %308 = vst.msk [vmem:[#allocation3 + $0x8] sm:$0x3] %vm307_vm6, %v4055_v1  ;;  %311 = vst.msk [vmem:[#allocation3 + $0x98] sm:$0x3] %vm307_vm6, %v4055_v1 }
  0x2f   : > { %v4333_v13 = vld [vmem:[#allocation2 + $0x61] sm:$0xff]  ;;  %v832_v21 = vld [vmem:[#allocation2 + $0x52] sm:$0xff]  ;;  %323 = vst.msk [vmem:[#allocation3 + $0x9] sm:$0x1] %vm312_vm5, %v4055_v1  ;;  %332 = vst.msk [vmem:[#allocation3 + $0x99] sm:$0x1] %vm312_vm5, %v4055_v1 }
  0x30   : > { %v831_v20 = vld [vmem:[#allocation2 + $0x42] sm:$0xff]  ;;  %v1435_v31 = vld [vmem:[#allocation2 + $0x91] sm:$0xff]  ;;  %v3316_v36 = vld [vmem:[%s4726_s2] ss:$0 sm:$0xff]  ;;  %s3991_s14 = scalar_lea.vmem %s4675_s29, 1024 }
  0x31   : > { %3578 = vmatmul.mubr.msk.f32.gmra.mrb[4].mxu0 %vm277_vm1, %v4281_v3  ;;  %v4289_v4 = vld [vmem:[#allocation2 + $0x70] sm:$0xff]  ;;  %v833_v22 = vld [vmem:[#allocation2 + $0x62] sm:$0xff]  ;;  %v3317_v38 = vld [vmem:[%s4727_s3] ss:$0 sm:$0xff]  ;;  %p3992_p11 = scmp.ne.s32.totalorder %s4675_s29, %s3991_s14  ;;  %p3999_p1 = scmp.lt.s32.totalorder %s3997_s18, %s3991_s14 }
  0x32   : > { %3580 = vmatprep.mubr.msk.f32.mxu0 %vm277_vm1, %v4283_v2  ;;  %v4339_v14 = vld [vmem:[#allocation2 + $0x71] sm:$0xff]  ;;  %v984_v25 = vld [vmem:[#allocation2 + $0x80] sm:$0xff] }
  0x33   : > { %v834_v23 = vld [vmem:[#allocation2 + $0x72] sm:$0xff]  ;;  %v1134_v27 = vld [vmem:[#allocation2 + $0x82] sm:$0xff]  ;;  %p3993_p12 = pnand %p3992_p11, %p4137_p5  ;;  %p4000_p2 = por %p3999_p1, %p3998_p0 }
  0x34   : > { %v1434_v30 = vld [vmem:[#allocation2 + $0x81] sm:$0xff]  ;;  %v1585_v32 = vld [vmem:[#allocation2 + $0x92] sm:$0xff] }
  0x35   : > { %3581 = vmatmul.mubr.msk.f32.gmra.mrb[6].mxu0 %vm277_vm1, %v4289_v4  ;;  %v3318_v35 = vld [vmem:[%s4728_s4 + $0x20] sm:$0xff]  ;;  %v3371_v33 = vld [vmem:[%s4728_s4 + $0x30] sm:$0xff]  ;;  %p3994_p13 = pneg %p3993_p12 }
  0x36   : > { %3585 = vmatprep.mubr.msk.f32.mxu0 %vm277_vm1, %v4224_v19  ;;  %v830_v19 = vld [vmem:[#allocation2 + $0x32] sm:$0xff]  ;;  %3709 = vmatprep.subr.mxu1 %v3318_v35 }
  0x37   : > { %p4001_p3 = pnand %p4000_p2, %p3994_p13 }
  0x39   : > { %3586 = vmatmul.mubr.msk.f32.vlgmr.msra.gmra.mrb[0].mxu0 %vm277_vm1, %v4229_v24  ;;  %v3286_v24 = vld [vmem:[%s4725_s1 + $0x18] sm:$0xf] }
  0x3a   : > { %3598 = vmatpush3.msk.msra.mxu0 %vm436_vm0, %v3246_v60  ;;  %3588 = vmatprep.mubr.msk.f32.mxu0 %vm277_vm1, %v386_v34  ;;  %v1777_v34 = vld [vmem:[#allocation3] sm:$0xff] }
  0x3b   : > { %3611 = vmatprep.subr.msk.mxu0 %vm436_vm0, %v3256_v5  ;;  %3697 = vmatprep.mubr.msk.f32.mxu1 %vm305_vm4, %v1777_v34 }
  0x3d   : > { %3589 = vmatmul.mubr.msk.f32.gmra.mrb[2].mxu0 %vm277_vm1, %v387_v40 }
  0x3e   : > { %3591 = vmatprep.mubr.msk.f32.mxu0 %vm277_vm1, %v388_v45 }
  0x41   : > { %3592 = vmatmul.mubr.msk.f32.gmra.mrb[4].mxu0 %vm277_vm1, %v389_v55 }
  0x42   : > { %3594 = vmatprep.mubr.msk.f32.mxu0 %vm277_vm1, %v390_v58 }
  0x45   : > { %3595 = vmatmul.mubr.msk.f32.gmra.mrb[6].mxu0 %vm277_vm1, %v391_v61 }
  0x46   : > { %3599 = vmatprep.mubr.msk.f32.mxu0 %vm277_vm1, %v677_v6 }
  0x49   : > { %3600 = vmatmul.mubr.msk.f32.vlgmr.msra.gmra.mrb[0].mxu0 %vm277_vm1, %v678_v7 }
  0x4a   : > { %3612 = vmatpush3.msk.msra.mxu0 %vm436_vm0, %v3256_v5  ;;  %3602 = vmatprep.mubr.msk.f32.mxu0 %vm277_vm1, %v4313_v8 }
  0x4b   : > { %3625 = vmatprep.subr.msk.mxu0 %vm436_vm0, %v3266_v9 }
  0x4d   : > { %3603 = vmatmul.mubr.msk.f32.gmra.mrb[2].mxu0 %vm277_vm1, %v4322_v10 }
  0x4e   : > { %3605 = vmatprep.mubr.msk.f32.mxu0 %vm277_vm1, %v4324_v11 }
  0x51   : > { %3606 = vmatmul.mubr.msk.f32.gmra.mrb[4].mxu0 %vm277_vm1, %v4331_v12 }
  0x52   : > { %3608 = vmatprep.mubr.msk.f32.mxu0 %vm277_vm1, %v4333_v13 }
  0x55   : > { %3609 = vmatmul.mubr.msk.f32.gmra.mrb[6].mxu0 %vm277_vm1, %v4339_v14 }
  0x56   : > { %3613 = vmatprep.mubr.msk.f32.mxu0 %vm277_vm1, %v827_v15  ;;  %v2044_v15 = vld [vmem:[#allocation3 + $0x1] sm:$0xff] }
  0x59   : > { %3614 = vmatmul.mubr.msk.f32.vlgmr.msra.gmra.mrb[0].mxu0 %vm277_vm1, %v828_v16 }
  0x5a   : > { %3626 = vmatpush3.msk.msra.mxu0 %vm436_vm0, %v3266_v9  ;;  %3616 = vmatprep.mubr.msk.f32.mxu0 %vm277_vm1, %v4344_v17 }
  0x5b   : > { %3639 = vmatprep.subr.msk.mxu0 %vm436_vm0, %v3276_v18 }
  0x5d   : > { %3617 = vmatmul.mubr.msk.f32.gmra.mrb[2].mxu0 %vm277_vm1, %v830_v19 }
  0x5e   : > { %3619 = vmatprep.mubr.msk.f32.mxu0 %vm277_vm1, %v831_v20 }
  0x61   : > { %3620 = vmatmul.mubr.msk.f32.gmra.mrb[4].mxu0 %vm277_vm1, %v832_v21 }
  0x62   : > { %3622 = vmatprep.mubr.msk.f32.mxu0 %vm277_vm1, %v833_v22 }
  0x65   : > { %3623 = vmatmul.mubr.msk.f32.gmra.mrb[6].mxu0 %vm277_vm1, %v834_v23 }
  0x66   : > { %3627 = vmatprep.mubr.msk.f32.mxu0 %vm277_vm1, %v4256_v59 }
  0x69   : > { %3628 = vmatmul.mubr.msk.f32.vlgmr.msra.gmra.mrb[0].mxu0 %vm277_vm1, %v4264_v62 }
  0x6a   : > { %3640 = vmatpush3.msk.msra.mxu0 %vm436_vm0, %v3276_v18  ;;  %3630 = vmatprep.mubr.msk.f32.mxu0 %vm277_vm1, %v4272_v63 }
  0x6b   : > { %3653 = vmatprep.subr.msk.mxu0 %vm436_vm0, %v3286_v24 }
  0x6d   : > { %3631 = vmatmul.mubr.msk.f32.gmra.mrb[2].mxu0 %vm277_vm1, %v4275_v0 }
  0x6e   : > { %3633 = vmatprep.mubr.msk.f32.mxu0 %vm277_vm1, %v4281_v3 }
  0x71   : > { %3634 = vmatmul.mubr.msk.f32.gmra.mrb[4].mxu0 %vm277_vm1, %v4283_v2 }
  0x72   : > { %3636 = vmatprep.mubr.msk.f32.mxu0 %vm277_vm1, %v4289_v4 }
  0x75   : > { %3637 = vmatmul.mubr.msk.f32.gmra.mrb[6].mxu0 %vm277_vm1, %v984_v25 }
  0x76   : > { %3641 = vmatprep.mubr.msk.f32.mxu0 %vm277_vm1, %v828_v16 }
  0x79   : > { %3642 = vmatmul.mubr.msk.f32.vlgmr.msra.gmra.mrb[0].mxu0 %vm277_vm1, %v4344_v17 }
  0x7a   : > { %3654 = vmatpush3.msk.msra.mxu0 %vm436_vm0, %v3286_v24  ;;  %3644 = vmatprep.mubr.msk.f32.mxu0 %vm277_vm1, %v830_v19 }
  0x7b   : > { %3667 = vmatprep.subr.msk.mxu0 %vm436_vm0, %v3296_v26 }
  0x7d   : > { %3645 = vmatmul.mubr.msk.f32.gmra.mrb[2].mxu0 %vm277_vm1, %v831_v20 }
  0x7e   : > { %3647 = vmatprep.mubr.msk.f32.mxu0 %vm277_vm1, %v832_v21 }
  0x81   : > { %3648 = vmatmul.mubr.msk.f32.gmra.mrb[4].mxu0 %vm277_vm1, %v833_v22 }
  0x82   : > { %3650 = vmatprep.mubr.msk.f32.mxu0 %vm277_vm1, %v834_v23 }
  0x85   : > { %3651 = vmatmul.mubr.msk.f32.gmra.mrb[6].mxu0 %vm277_vm1, %v1134_v27 }
  0x86   : > { %3655 = vmatprep.mubr.msk.f32.mxu0 %vm277_vm1, %v4264_v62 }
  0x89   : > { %3656 = vmatmul.mubr.msk.f32.vlgmr.msra.gmra.mrb[0].mxu0 %vm277_vm1, %v4272_v63 }
  0x8a   : > { %3668 = vmatpush3.msk.msra.mxu0 %vm436_vm0, %v3296_v26  ;;  %3658 = vmatprep.mubr.msk.f32.mxu0 %vm277_vm1, %v4275_v0  ;;  %v3362_v26 = vld [vmem:[%s4728_s4 + $0x28] sm:$0xff] }
  0x8b   : > { %3681 = vmatprep.subr.msk.mxu0 %vm436_vm0, %v3306_v28 }
  0x8d   : > { %3659 = vmatmul.mubr.msk.f32.gmra.mrb[2].mxu0 %vm277_vm1, %v4281_v3 }
  0x8e   : > { %3661 = vmatprep.mubr.msk.f32.mxu0 %vm277_vm1, %v4283_v2 }
  0x91   : > { %3662 = vmatmul.mubr.msk.f32.gmra.mrb[4].mxu0 %vm277_vm1, %v4289_v4  ;;  %v3335_v4 = vld [vmem:[%s4728_s4 + $0x8] sm:$0xff] }
  0x92   : > { %3664 = vmatprep.mubr.msk.f32.mxu0 %vm277_vm1, %v984_v25 }
  0x95   : > { %3665 = vmatmul.mubr.msk.f32.gmra.mrb[6].mxu0 %vm277_vm1, %v1285_v29 }
  0x96   : > { %3669 = vmatprep.mubr.msk.f32.mxu0 %vm277_vm1, %v4313_v8 }
  0x99   : > { %3670 = vmatmul.mubr.msk.f32.vlgmr.msra.gmra.mrb[0].mxu0 %vm277_vm1, %v4322_v10 }
  0x9a   : > { %3682 = vmatpush3.msk.msra.mxu0 %vm436_vm0, %v3306_v28  ;;  %3672 = vmatprep.mubr.msk.f32.mxu0 %vm277_vm1, %v4324_v11 }
  0x9d   : > { %3673 = vmatmul.mubr.msk.f32.gmra.mrb[2].mxu0 %vm277_vm1, %v4331_v12 }
  0x9e   : > { %3675 = vmatprep.mubr.msk.f32.mxu0 %vm277_vm1, %v4333_v13 }
  0xa1   : > { %3676 = vmatmul.mubr.msk.f32.gmra.mrb[4].mxu0 %vm277_vm1, %v4339_v14  ;;  %v3344_v14 = vld [vmem:[%s4728_s4 + $0x10] sm:$0xff] }
  0xa2   : > { %3678 = vmatprep.mubr.msk.f32.mxu0 %vm277_vm1, %v1434_v30 }
  0xa5   : > { %3679 = vmatmul.mubr.msk.f32.gmra.mrb[6].mxu0 %vm277_vm1, %v1435_v31 }
  0xa6   : > { %3683 = vmatprep.mubr.msk.f32.mxu0 %vm277_vm1, %v4344_v17  ;;  %v3353_v17 = vld [vmem:[%s4728_s4 + $0x18] sm:$0xff] }
  0xa9   : > { %3684 = vmatmul.mubr.msk.f32.vlgmr.msra.gmra.mrb[0].mxu0 %vm277_vm1, %v830_v19 }
  0xaa   : > { %3686 = vmatprep.mubr.msk.f32.mxu0 %vm277_vm1, %v831_v20 }
  0xad   : > { %3687 = vmatmul.mubr.msk.f32.gmra.mrb[2].mxu0 %vm277_vm1, %v832_v21 }
  0xae   : > { %3689 = vmatprep.mubr.msk.f32.mxu0 %vm277_vm1, %v833_v22 }
  0xb1   : > { %3690 = vmatmul.mubr.msk.f32.gmra.mrb[4].mxu0 %vm277_vm1, %v834_v23  ;;  %v2191_v23 = vld [vmem:[#allocation3 + $0x2] sm:$0xff] }
  0xb2   : > { %3692 = vmatprep.mubr.msk.f32.mxu0 %vm277_vm1, %v1134_v27 }
  0xb5   : > { %3693 = vmatmul.mubr.msk.f32.gmra.mrb[6].mxu0 %vm277_vm1, %v1585_v32 }
 0x17c   : > { %v3685_v37 = vpop.f32.mrb[0].mxu0 }
 0x17d   : > { %v1736_v39 = vmul.f32 %v3685_v37, %v3316_v36  ;;  %v1681_v40 = vpop.f32.mrb[1].mxu0  ;;  %v3389_v37 = vld [vmem:[%s4728_s4 + $0x40] sm:$0xff] }
 0x17e   : > { %v1735_v41 = vmul.f32 %v3316_v36, %v1681_v40  ;;  %v2787_v40 = vld [vmem:[#allocation3 + $0x91] sm:$0xff] }
 0x17f   : > { %v1751_v42 = vadd.f32 %v3317_v38, %v1736_v39 }
 0x180   : > { %v1750_v43 = vadd.f32 %v3317_v38, %v1735_v41  ;;  %v3688_v44 = vpop.f32.mrb[2].mxu0  ;;  %v2934_v41 = vld [vmem:[#allocation3 + $0x92] sm:$0xff] }
 0x181   : > { %v1759_v45 = vmax.f32 %v1751_v42, 0.0  ;;  %v1738_v46 = vmul.f32 %v3688_v44, %v3316_v36  ;;  %v1691_v47 = vpop.f32.mrb[3].mxu0  ;;  %v3398_v42 = vld [vmem:[%s4729_s5] ss:$0 sm:$0xff] }
 0x182   : > { %v1758_v48 = vmax.f32 %v1750_v43, 0.0  ;;  %v1737_v1 = vmul.f32 %v3316_v36, %v1691_v47  ;;  %v3399_v44 = vld [vmem:[%s4730_s6] ss:$0 sm:$0xff] }
 0x183   : > { %1768 = vst.msk [vmem:[#allocation3 + $0x21] sm:$0xff] %vm305_vm4, %v1759_v45  ;;  %v1753_v49 = vadd.f32 %v3317_v38, %v1738_v46 }
 0x184   : > { %1767 = vst.msk [vmem:[#allocation3 + $0x11] sm:$0xff] %vm305_vm4, %v1758_v48  ;;  %v1752_v50 = vadd.f32 %v3317_v38, %v1737_v1  ;;  %v3691_v51 = vpop.f32.mrb[4].mxu0 }
 0x185   : > { %v1761_v52 = vmax.f32 %v1753_v49, 0.0  ;;  %v1740_v53 = vmul.f32 %v3691_v51, %v3316_v36  ;;  %v1701_v54 = vpop.f32.mrb[5].mxu0 }
 0x186   : > { %v1760_v55 = vmax.f32 %v1752_v50, 0.0  ;;  %v1739_v56 = vmul.f32 %v3316_v36, %v1701_v54 }
 0x187   : > { %1770 = vst.msk [vmem:[#allocation3 + $0x41] sm:$0xff] %vm305_vm4, %v1761_v52  ;;  %v1755_v57 = vadd.f32 %v3317_v38, %v1740_v53 }
 0x188   : > { %1769 = vst.msk [vmem:[#allocation3 + $0x31] sm:$0xff] %vm305_vm4, %v1760_v55  ;;  %v1754_v58 = vadd.f32 %v3317_v38, %v1739_v56  ;;  %v3694_v59 = vpop.f32.mrb[6].mxu0 }
 0x189   : > { %v1763_v60 = vmax.f32 %v1755_v57, 0.0  ;;  %v1742_v61 = vmul.f32 %v3694_v59, %v3316_v36  ;;  %v1711_v62 = vpop.f32.mrb[7].mxu0 }
 0x18a   : > { %v1762_v63 = vmax.f32 %v1754_v58, 0.0  ;;  %v1741_v0 = vmul.f32 %v3316_v36, %v1711_v62  ;;  %v4504_v6 = vld [vmem:[#allocation3 + $0x20] sm:$0xff] }
 0x18b   : > { %1772 = vst.msk [vmem:[#allocation3 + $0x61] sm:$0xff] %vm305_vm4, %v1763_v60  ;;  %v1757_v3 = vadd.f32 %v3317_v38, %v1742_v61  ;;  %v4496_v2 = vld [vmem:[#allocation3 + $0x10] sm:$0xff]  ;;  %v4546_v18 = vld [vmem:[#allocation3 + $0x21] sm:$0xff] }
 0x18c   : > { %1771 = vst.msk [vmem:[#allocation3 + $0x51] sm:$0xff] %vm305_vm4, %v1762_v63  ;;  %v1756_v5 = vadd.f32 %v3317_v38, %v1741_v0  ;;  %3698 = vmatmul.mubr.msk.f32.vlgmr.msra.gmra.mrb[0].mxu1 %vm305_vm4, %v4496_v2  ;;  %v2045_v16 = vld [vmem:[#allocation3 + $0x11] sm:$0xff]  ;;  %v2193_v27 = vld [vmem:[#allocation3 + $0x22] sm:$0xff] }
 0x18d   : > { %v1765_v7 = vmax.f32 %v1757_v3, 0.0  ;;  %3710 = vmatpush3.msra.mxu1 %v3318_v35  ;;  %3700 = vmatprep.mubr.msk.f32.mxu1 %vm305_vm4, %v4504_v6  ;;  %v2192_v25 = vld [vmem:[#allocation3 + $0x12] sm:$0xff] }
 0x18e   : > { %v1764_v8 = vmax.f32 %v1756_v5, 0.0  ;;  %3723 = vmatprep.subr.mxu1 %v3335_v4  ;;  %v4514_v10 = vld [vmem:[#allocation3 + $0x40] sm:$0xff]  ;;  %v3380_v35 = vld [vmem:[%s4728_s4 + $0x38] sm:$0xff]  ;;  %v2640_v38 = vld [vmem:[#allocation3 + $0x90] sm:$0xff] }
 0x18f   : > { %1774 = vst.msk [vmem:[#allocation3 + $0x81] sm:$0xff] %vm305_vm4, %v1765_v7  ;;  %v4509_v9 = vld [vmem:[#allocation3 + $0x30] sm:$0xff]  ;;  %v4554_v20 = vld [vmem:[#allocation3 + $0x41] sm:$0xff] }
 0x190   : > { %1773 = vst.msk [vmem:[#allocation3 + $0x71] sm:$0xff] %vm305_vm4, %v1764_v8  ;;  %3701 = vmatmul.mubr.msk.f32.gmra.mrb[2].mxu1 %vm305_vm4, %v4509_v9  ;;  %v4550_v19 = vld [vmem:[#allocation3 + $0x31] sm:$0xff]  ;;  %v2195_v29 = vld [vmem:[#allocation3 + $0x42] sm:$0xff] }
 0x191   : > { %3703 = vmatprep.mubr.msk.f32.mxu1 %vm305_vm4, %v4514_v10  ;;  %v2194_v28 = vld [vmem:[#allocation3 + $0x32] sm:$0xff] }
 0x192   : > { %v4522_v12 = vld [vmem:[#allocation3 + $0x60] sm:$0xff] }
 0x193   : > { %v4518_v11 = vld [vmem:[#allocation3 + $0x50] sm:$0xff]  ;;  %v4562_v22 = vld [vmem:[#allocation3 + $0x61] sm:$0xff] }
 0x194   : > { %3704 = vmatmul.mubr.msk.f32.gmra.mrb[4].mxu1 %vm305_vm4, %v4518_v11  ;;  %v4558_v21 = vld [vmem:[#allocation3 + $0x51] sm:$0xff]  ;;  %v2197_v31 = vld [vmem:[#allocation3 + $0x62] sm:$0xff] }
 0x195   : > { %3706 = vmatprep.mubr.msk.f32.mxu1 %vm305_vm4, %v4522_v12  ;;  %v2196_v30 = vld [vmem:[#allocation3 + $0x52] sm:$0xff] }
 0x196   : > { %v2345_v34 = vld [vmem:[#allocation3 + $0x80] sm:$0xff] }
 0x197   : > { %v4526_v13 = vld [vmem:[#allocation3 + $0x70] sm:$0xff]  ;;  %v2492_v36 = vld [vmem:[#allocation3 + $0x82] sm:$0xff] }
 0x198   : > { %3707 = vmatmul.mubr.msk.f32.gmra.mrb[6].mxu1 %vm305_vm4, %v4526_v13  ;;  %v2051_v24 = vld [vmem:[#allocation3 + $0x71] sm:$0xff]  ;;  %v2786_v39 = vld [vmem:[#allocation3 + $0x81] sm:$0xff] }
 0x199   : > { %3711 = vmatprep.mubr.msk.f32.mxu1 %vm305_vm4, %v1758_v48  ;;  %v2198_v32 = vld [vmem:[#allocation3 + $0x72] sm:$0xff] }
 0x19c   : > { %3712 = vmatmul.mubr.msk.f32.vlgmr.msra.gmra.mrb[0].mxu1 %vm305_vm4, %v1759_v45 }
 0x19d   : > { %3724 = vmatpush3.msra.mxu1 %v3335_v4  ;;  %3714 = vmatprep.mubr.msk.f32.mxu1 %vm305_vm4, %v1760_v55 }
 0x19e   : > { %3737 = vmatprep.subr.mxu1 %v3344_v14 }
 0x1a0   : > { %3715 = vmatmul.mubr.msk.f32.gmra.mrb[2].mxu1 %vm305_vm4, %v1761_v52 }
 0x1a1   : > { %3717 = vmatprep.mubr.msk.f32.mxu1 %vm305_vm4, %v1762_v63 }
 0x1a4   : > { %3718 = vmatmul.mubr.msk.f32.gmra.mrb[4].mxu1 %vm305_vm4, %v1763_v60 }
 0x1a5   : > { %3720 = vmatprep.mubr.msk.f32.mxu1 %vm305_vm4, %v1764_v8 }
 0x1a8   : > { %3721 = vmatmul.mubr.msk.f32.gmra.mrb[6].mxu1 %vm305_vm4, %v1765_v7 }
 0x1a9   : > { %3725 = vmatprep.mubr.msk.f32.mxu1 %vm305_vm4, %v2044_v15 }
 0x1ac   : > { %3726 = vmatmul.mubr.msk.f32.vlgmr.msra.gmra.mrb[0].mxu1 %vm305_vm4, %v2045_v16 }
 0x1ad   : > { %3738 = vmatpush3.msra.mxu1 %v3344_v14  ;;  %3728 = vmatprep.mubr.msk.f32.mxu1 %vm305_vm4, %v4546_v18 }
 0x1ae   : > { %3751 = vmatprep.subr.mxu1 %v3353_v17 }
 0x1b0   : > { %3729 = vmatmul.mubr.msk.f32.gmra.mrb[2].mxu1 %vm305_vm4, %v4550_v19 }
 0x1b1   : > { %3731 = vmatprep.mubr.msk.f32.mxu1 %vm305_vm4, %v4554_v20 }
 0x1b4   : > { %3732 = vmatmul.mubr.msk.f32.gmra.mrb[4].mxu1 %vm305_vm4, %v4558_v21 }
 0x1b5   : > { %3734 = vmatprep.mubr.msk.f32.mxu1 %vm305_vm4, %v4562_v22 }
 0x1b8   : > { %3735 = vmatmul.mubr.msk.f32.gmra.mrb[6].mxu1 %vm305_vm4, %v2051_v24 }
 0x1b9   : > { %3739 = vmatprep.mubr.msk.f32.mxu1 %vm305_vm4, %v2191_v23 }
 0x1bc   : > { %3740 = vmatmul.mubr.msk.f32.vlgmr.msra.gmra.mrb[0].mxu1 %vm305_vm4, %v2192_v25 }
 0x1bd   : > { %3752 = vmatpush3.msra.mxu1 %v3353_v17  ;;  %3742 = vmatprep.mubr.msk.f32.mxu1 %vm305_vm4, %v2193_v27 }
 0x1be   : > { %3765 = vmatprep.subr.mxu1 %v3362_v26 }
 0x1c0   : > { %3743 = vmatmul.mubr.msk.f32.gmra.mrb[2].mxu1 %vm305_vm4, %v2194_v28 }
 0x1c1   : > { %3745 = vmatprep.mubr.msk.f32.mxu1 %vm305_vm4, %v2195_v29 }
 0x1c4   : > { %3746 = vmatmul.mubr.msk.f32.gmra.mrb[4].mxu1 %vm305_vm4, %v2196_v30 }
 0x1c5   : > { %3748 = vmatprep.mubr.msk.f32.mxu1 %vm305_vm4, %v2197_v31 }
 0x1c8   : > { %3749 = vmatmul.mubr.msk.f32.gmra.mrb[6].mxu1 %vm305_vm4, %v2198_v32 }
 0x1c9   : > { %3753 = vmatprep.mubr.msk.f32.mxu1 %vm305_vm4, %v4496_v2 }
 0x1cc   : > { %3754 = vmatmul.mubr.msk.f32.vlgmr.msra.gmra.mrb[0].mxu1 %vm305_vm4, %v4504_v6 }
 0x1cd   : > { %3766 = vmatpush3.msra.mxu1 %v3362_v26  ;;  %3756 = vmatprep.mubr.msk.f32.mxu1 %vm305_vm4, %v4509_v9 }
 0x1ce   : > { %3779 = vmatprep.subr.mxu1 %v3371_v33 }
 0x1d0   : > { %3757 = vmatmul.mubr.msk.f32.gmra.mrb[2].mxu1 %vm305_vm4, %v4514_v10 }
 0x1d1   : > { %3759 = vmatprep.mubr.msk.f32.mxu1 %vm305_vm4, %v4518_v11 }
 0x1d4   : > { %3760 = vmatmul.mubr.msk.f32.gmra.mrb[4].mxu1 %vm305_vm4, %v4522_v12 }
 0x1d5   : > { %3762 = vmatprep.mubr.msk.f32.mxu1 %vm305_vm4, %v4526_v13 }
 0x1d8   : > { %3763 = vmatmul.mubr.msk.f32.gmra.mrb[6].mxu1 %vm305_vm4, %v2345_v34 }
 0x1d9   : > { %3767 = vmatprep.mubr.msk.f32.mxu1 %vm305_vm4, %v2192_v25 }
 0x1dc   : > { %3768 = vmatmul.mubr.msk.f32.vlgmr.msra.gmra.mrb[0].mxu1 %vm305_vm4, %v2193_v27 }
 0x1dd   : > { %3780 = vmatpush3.msra.mxu1 %v3371_v33  ;;  %3770 = vmatprep.mubr.msk.f32.mxu1 %vm305_vm4, %v2194_v28 }
 0x1de   : > { %3793 = vmatprep.subr.mxu1 %v3380_v35 }
 0x1e0   : > { %3771 = vmatmul.mubr.msk.f32.gmra.mrb[2].mxu1 %vm305_vm4, %v2195_v29 }
 0x1e1   : > { %3773 = vmatprep.mubr.msk.f32.mxu1 %vm305_vm4, %v2196_v30 }
 0x1e4   : > { %3774 = vmatmul.mubr.msk.f32.gmra.mrb[4].mxu1 %vm305_vm4, %v2197_v31 }
 0x1e5   : > { %3776 = vmatprep.mubr.msk.f32.mxu1 %vm305_vm4, %v2198_v32 }
 0x1e8   : > { %3777 = vmatmul.mubr.msk.f32.gmra.mrb[6].mxu1 %vm305_vm4, %v2492_v36 }
 0x1e9   : > { %3781 = vmatprep.mubr.msk.f32.mxu1 %vm305_vm4, %v4504_v6 }
 0x1ec   : > { %3782 = vmatmul.mubr.msk.f32.vlgmr.msra.gmra.mrb[0].mxu1 %vm305_vm4, %v4509_v9 }
 0x1ed   : > { %3794 = vmatpush3.msra.mxu1 %v3380_v35  ;;  %3784 = vmatprep.mubr.msk.f32.mxu1 %vm305_vm4, %v4514_v10 }
 0x1ee   : > { %3807 = vmatprep.subr.mxu1 %v3389_v37 }
 0x1f0   : > { %3785 = vmatmul.mubr.msk.f32.gmra.mrb[2].mxu1 %vm305_vm4, %v4518_v11 }
 0x1f1   : > { %3787 = vmatprep.mubr.msk.f32.mxu1 %vm305_vm4, %v4522_v12 }
 0x1f4   : > { %3788 = vmatmul.mubr.msk.f32.gmra.mrb[4].mxu1 %vm305_vm4, %v4526_v13 }
 0x1f5   : > { %3790 = vmatprep.mubr.msk.f32.mxu1 %vm305_vm4, %v2345_v34 }
 0x1f8   : > { %3791 = vmatmul.mubr.msk.f32.gmra.mrb[6].mxu1 %vm305_vm4, %v2640_v38 }
 0x1f9   : > { %3795 = vmatprep.mubr.msk.f32.mxu1 %vm305_vm4, %v4546_v18 }
 0x1fc   : > { %3796 = vmatmul.mubr.msk.f32.vlgmr.msra.gmra.mrb[0].mxu1 %vm305_vm4, %v4550_v19 }
 0x1fd   : > { %3808 = vmatpush3.msra.mxu1 %v3389_v37  ;;  %3798 = vmatprep.mubr.msk.f32.mxu1 %vm305_vm4, %v4554_v20 }
 0x200   : > { %3799 = vmatmul.mubr.msk.f32.gmra.mrb[2].mxu1 %vm305_vm4, %v4558_v21 }
 0x201   : > { %3801 = vmatprep.mubr.msk.f32.mxu1 %vm305_vm4, %v4562_v22 }
 0x204   : > { %3802 = vmatmul.mubr.msk.f32.gmra.mrb[4].mxu1 %vm305_vm4, %v2051_v24 }
 0x205   : > { %3804 = vmatprep.mubr.msk.f32.mxu1 %vm305_vm4, %v2786_v39 }
 0x208   : > { %3805 = vmatmul.mubr.msk.f32.gmra.mrb[6].mxu1 %vm305_vm4, %v2787_v40 }
 0x209   : > { %3809 = vmatprep.mubr.msk.f32.mxu1 %vm305_vm4, %v2193_v27 }
 0x20c   : > { %3810 = vmatmul.mubr.msk.f32.vlgmr.msra.gmra.mrb[0].mxu1 %vm305_vm4, %v2194_v28 }
 0x20d   : > { %3812 = vmatprep.mubr.msk.f32.mxu1 %vm305_vm4, %v2195_v29 }
 0x210   : > { %3813 = vmatmul.mubr.msk.f32.gmra.mrb[2].mxu1 %vm305_vm4, %v2196_v30 }
 0x211   : > { %3815 = vmatprep.mubr.msk.f32.mxu1 %vm305_vm4, %v2197_v31 }
 0x214   : > { %3816 = vmatmul.mubr.msk.f32.gmra.mrb[4].mxu1 %vm305_vm4, %v2198_v32 }
 0x215   : > { %3818 = vmatprep.mubr.msk.f32.mxu1 %vm305_vm4, %v2492_v36 }
 0x218   : > { %3819 = vmatmul.mubr.msk.f32.gmra.mrb[6].mxu1 %vm305_vm4, %v2934_v41 }
 0x2df   : > { %v3811_v43 = vpop.f32.mrb[0].mxu1 }
 0x2e0   : > { %v3082_v45 = vmul.f32 %v3811_v43, %v3398_v42  ;;  %v3027_v46 = vpop.f32.mrb[1].mxu1 }
 0x2e1   : > { %v3081_v47 = vmul.f32 %v3398_v42, %v3027_v46 }
 0x2e2   : > { %v3097_v48 = vadd.f32 %v3399_v44, %v3082_v45 }
 0x2e3   : > { %v3096_v1 = vadd.f32 %v3399_v44, %v3081_v47  ;;  %v3814_v49 = vpop.f32.mrb[2].mxu1 }
 0x2e4   : > { %v3105_v50 = vmax.f32 %v3097_v48, 0.0  ;;  %v3084_v51 = vmul.f32 %v3814_v49, %v3398_v42  ;;  %v3037_v52 = vpop.f32.mrb[3].mxu1 }
 0x2e5   : > { %v3104_v53 = vmax.f32 %v3096_v1, 0.0  ;;  %v3083_v54 = vmul.f32 %v3398_v42, %v3037_v52 }
 0x2e6   : > { %3113 = vst.msk [vmem:[%s4654_s22 + $0x8] sm:$0xff] %vm305_vm4, %v3105_v50  ;;  %v3099_v55 = vadd.f32 %v3399_v44, %v3084_v51 }
 0x2e7   : > { %3112 = vst.msk [vmem:[%s4654_s22] sm:$0xff] %vm305_vm4, %v3104_v53  ;;  %v3098_v56 = vadd.f32 %v3399_v44, %v3083_v54  ;;  %v3817_v57 = vpop.f32.mrb[4].mxu1 }
 0x2e8   : > { %v3107_v58 = vmax.f32 %v3099_v55, 0.0  ;;  %v3086_v59 = vmul.f32 %v3817_v57, %v3398_v42  ;;  %v3047_v60 = vpop.f32.mrb[5].mxu1 }
 0x2e9   : > { %v3106_v61 = vmax.f32 %v3098_v56, 0.0  ;;  %v3085_v62 = vmul.f32 %v3398_v42, %v3047_v60 }
 0x2ea   : > { %3115 = vst.msk [vmem:[%s4654_s22 + $0x18] sm:$0xff] %vm305_vm4, %v3107_v58  ;;  %v3101_v63 = vadd.f32 %v3399_v44, %v3086_v59 }
 0x2eb   : > { %3114 = vst.msk [vmem:[%s4654_s22 + $0x10] sm:$0xff] %vm305_vm4, %v3106_v61  ;;  %v3100_v0 = vadd.f32 %v3399_v44, %v3085_v62  ;;  %v3820_v3 = vpop.f32.mrb[6].mxu1 }
 0x2ec   : > { %v3109_v2 = vmax.f32 %v3101_v63, 0.0  ;;  %v3088_v4 = vmul.f32 %v3820_v3, %v3398_v42  ;;  %v3057_v5 = vpop.f32.mrb[7].mxu1 }
 0x2ed   : > { %v3108_v6 = vmax.f32 %v3100_v0, 0.0  ;;  %v3087_v7 = vmul.f32 %v3398_v42, %v3057_v5 }
 0x2ee   : > { %3117 = vst.msk [vmem:[%s4654_s22 + $0x28] sm:$0xff] %vm305_vm4, %v3109_v2  ;;  %v3103_v8 = vadd.f32 %v3399_v44, %v3088_v4 }
 0x2ef   : > { %3116 = vst.msk [vmem:[%s4654_s22 + $0x20] sm:$0xff] %vm305_vm4, %v3108_v6  ;;  %v3102_v9 = vadd.f32 %v3399_v44, %v3087_v7 }
 0x2f0   : > { %v3111_v10 = vmax.f32 %v3103_v8, 0.0 }
 0x2f1   : > { %v3110_v11 = vmax.f32 %v3102_v9, 0.0 }
 0x2f2   : > { %3119 = vst.msk [vmem:[%s4654_s22 + $0x38] sm:$0xff] %vm305_vm4, %v3111_v10 }
 0x2f3   : > { %3118 = vst.msk [vmem:[%s4654_s22 + $0x30] sm:$0xff] %vm305_vm4, %v3110_v11 }
 0x2f4   : > { %4004 = shalt.err (!%p4001_p3)
}
 0x2f5   : > { %s4005_s16 = scalar_lea.hbm %s4673_s13, 1024  ;;  %s4009_s21 = scalar_lea.hbm %s4731_s7, 2048 }
 0x2f6   : > { %p4006_p4 = scmp.ne.s32.totalorder %s4673_s13, %s4005_s16  ;;  %p4010_p9 = scmp.lt.u32.totalorder %s4673_s13, %s4731_s7 }
 0x2f7   : > { %p4011_p10 = scmp.lt.u32.totalorder %s4009_s21, %s4005_s16  ;;  %p4013_p12 = scmp.lt.u32.totalorder %s4005_s16, %s4673_s13 }
 0x2f8   : > { %p4007_p7 = pnand %p4006_p4, %p4137_p5 }
 0x2f9   : > { %p4012_p11 = por %p4011_p10, %p4010_p9 }
 0x2fa   : > { %p4008_p8 = pneg %p4007_p7 }
 0x2fb   : > { %p4014_p13 = por %p4013_p12, %p4012_p11 }
 0x2fd   : > { %p4015_p0 = pnand %p4014_p13, %p4008_p8 }
 0x2ff   : > { %4018 = shalt.err (!%p4015_p0)
}
 0x300   : > { %s4057_s8 = smov 128   ;;  %s4058_s9 = smov 8  }
 0x301   : > { %3949 = dma.vmem_to_hbm [thread:$0]  (%p4137_p5), %s4675_s29, 1024, %s4673_s13, %s4683_s28, %s4057_s8, %s4057_s8, %s4058_s9  }
 0x302 PF: > { %p3955_p1 = scmp.ge.s32.totalorder %s4053_s27, 2  ;;  %s3149_s14 = sand.u32 1, %s4041_s24  }
 0x303   : > { %s3150_s15 = scalar_lea.sflag [#allocation5], %s3149_s14 }
 0x304   : > { %p3952_p2 = pnand %p3955_p1, %p4141_p6 }
 0x306   : > { %4036 = dma.done.wait (!%p3952_p2), %s3150_s15, 1024  }
 0x307   : > { %4038 = vsyncadd (!%p3952_p2), %s3150_s15, 4294966272  ;;  %p17_p3 = scmp.ge.s32.totalorder %s4124_s30, 4   ;;  %s4734_s24 = smov %s4045_s25 }
 0x308   : > { %s4735_s25 = smov %s4049_s26  ;;  %s4736_s26 = smov %s4135_s10 }
 0x309   : > { %s4737_s27 = smov %s4124_s30  ;;  %19 = sbr.rel (!%p17_p3) target bundleno = 3 (0x3), region = 108 }
 0x310   :  { %3155 = vsyncpa [#allocation5], 1 }
 0x311   :  { %3157 = vsyncpa [#allocation5 + $0x1], 1 }

</bundles_post_ra>
